<compile_context>
chip_gen: v7x
topology: tpu7x:2x2x1
jax: 0.10.0
libtpu: 0.0.40
codegen_flags: <defaults>
</compile_context>

<pallas_src>
import functools

import jax
import jax.numpy as jnp
from jax.experimental import pallas as pl
from jax.experimental.pallas import tpu as pltpu

HIDDEN = 512          # hidden_channels in the module
WIN_IN = 1949         # pretransform_win input dim
EXP_IN = 100          # pretransform_exp input dim
EY_IN = 250           # pretransform_ey input dim (unused: EGBBlock not provided)
OUT_DIM = 100         # final pyg.Linear(hidden, 100)
NUM_LAYERS = 4
LEAKY_ALPHA = 0.2

_VMEM_LIMIT = 32 * 1024 * 1024   # safe on v5e/v6e/v7x; largest block set is ~4.2 MiB


def _round_up(x, m):
    return ((x + m - 1) // m) * m


# ----------------------------------------------------------------------------
# Kernel 1: fused linear   out = leaky_relu(x @ w + b)   (single grid point)
# ----------------------------------------------------------------------------
def _linear_kernel(x_ref, w_ref, b_ref, o_ref, *, alpha):
    r = jnp.dot(x_ref[...], w_ref[...], preferred_element_type=jnp.float32)
    r = r + b_ref[...]                      # bias / epilogue in f32 (v5e-safe)
    if alpha is not None:
        r = jnp.where(r >= 0, r, alpha * r)
    o_ref[...] = r.astype(o_ref.dtype)


def pallas_linear(x, w, b, alpha=None, out_dtype=jnp.bfloat16):
    """x:[Mp,Kp] bf16, w:[Kp,Np] bf16 (pre-padded), b:[1,Np] f32 -> [Mp,Np]."""
    Mp, Kp = x.shape
    Kp2, Np = w.shape
    assert Kp == Kp2, (Kp, Kp2)
    out_bytes = Mp * Np * jnp.dtype(out_dtype).itemsize
    cost = pl.CostEstimate(
        flops=2 * Mp * Kp * Np,
        transcendentals=0,
        bytes_accessed=x.size * 2 + w.size * 2 + b.size * 4 + out_bytes)
    return pl.pallas_call(
        functools.partial(_linear_kernel, alpha=alpha),
        out_shape=jax.ShapeDtypeStruct((Mp, Np), out_dtype),
        grid_spec=pltpu.PrefetchScalarGridSpec(
            num_scalar_prefetch=0,
            grid=(1,),
            in_specs=[
                pl.BlockSpec((Mp, Kp), lambda i: (0, 0)),
                pl.BlockSpec((Kp, Np), lambda i: (0, 0)),
                pl.BlockSpec((1, Np), lambda i: (0, 0)),
            ],
            out_specs=pl.BlockSpec((Mp, Np), lambda i: (0, 0)),
        ),
        compiler_params=pltpu.CompilerParams(
            dimension_semantics=("arbitrary",),
            vmem_limit_bytes=_VMEM_LIMIT),
        cost_estimate=cost,
    )(x, w, b)


# ----------------------------------------------------------------------------
# Kernel 2: fused SAGEConv + LeakyReLU, batched over relations (grid axis = 2)
#   out[r] = leaky( (adj[r] @ x[r]) @ W_l[r] + x[r] @ W_r[r] + b[r] )
# adj is the row-normalized dense adjacency, so adj @ x == scatter_mean.
# ----------------------------------------------------------------------------
def _sage_kernel(adj_ref, x_ref, wl_ref, wr_ref, b_ref, o_ref, *, alpha):
    x = x_ref[...]                                                     # (NP, H) bf16
    aggr = jnp.dot(adj_ref[...], x, preferred_element_type=jnp.float32)  # mean aggr
    r = jnp.dot(aggr.astype(x.dtype), wl_ref[...],
                preferred_element_type=jnp.float32)                    # lin_l
    r = r + jnp.dot(x, wr_ref[...], preferred_element_type=jnp.float32)  # lin_r
    r = r + b_ref[...]
    r = jnp.where(r >= 0, r, alpha * r)
    o_ref[...] = r.astype(o_ref.dtype)


def pallas_hetero_sage(adj, x, wl, wr, b, alpha):
    """adj:[R,NP,NP] bf16, x:[R,NP,H] bf16, wl/wr:[R,H,H] bf16, b:[R,1,H] f32."""
    R, NP, _ = adj.shape
    _, _, H = x.shape
    cost = pl.CostEstimate(
        flops=R * 2 * (NP * NP * H + 2 * NP * H * H),
        transcendentals=0,
        bytes_accessed=(adj.size + 2 * x.size + wl.size + wr.size) * 2 + b.size * 4)
    return pl.pallas_call(
        functools.partial(_sage_kernel, alpha=alpha),
        out_shape=jax.ShapeDtypeStruct(x.shape, x.dtype),
        grid_spec=pltpu.PrefetchScalarGridSpec(
            num_scalar_prefetch=0,
            grid=(R,),
            in_specs=[
                pl.BlockSpec((None, NP, NP), lambda r: (r, 0, 0)),
                pl.BlockSpec((None, NP, H), lambda r: (r, 0, 0)),
                pl.BlockSpec((None, H, H), lambda r: (r, 0, 0)),
                pl.BlockSpec((None, H, H), lambda r: (r, 0, 0)),
                pl.BlockSpec((None, 1, H), lambda r: (r, 0, 0)),
            ],
            out_specs=pl.BlockSpec((None, NP, H), lambda r: (r, 0, 0)),
        ),
        compiler_params=pltpu.CompilerParams(
            dimension_semantics=("parallel",),      # v7x: shard relations over 2 TCs
            vmem_limit_bytes=_VMEM_LIMIT),
        cost_estimate=cost,
    )(adj, x, wl, wr, b)


# ----------------------------------------------------------------------------
# Graph glue
# ----------------------------------------------------------------------------
def dense_mean_adj(edge_index, np_pad):
    """Row-normalized dense adjacency A[dst, src] so A @ x == scatter_mean."""
    src, dst = edge_index
    A = jnp.zeros((np_pad, np_pad), jnp.float32).at[dst, src].add(1.0)
    deg = A.sum(axis=1, keepdims=True)
    return (A / jnp.maximum(deg, 1.0)).astype(jnp.bfloat16)


# ----------------------------------------------------------------------------
# Parameters (deterministic, synthetic) — pre-padded & pre-cast to bf16 ONCE
# ----------------------------------------------------------------------------
def _pad2(w, kp, npad):
    k, n = w.shape
    return jnp.zeros((kp, npad), w.dtype).at[:k, :n].set(w)


def init_params(key):
    def w(k, i, o, scale=0.02):
        return scale * jax.random.normal(k, (i, o), jnp.float32)

    H = HIDDEN
    WIN_KP = _round_up(WIN_IN, 128)
    EXP_KP = _round_up(EXP_IN, 128)
    OUT_NP = _round_up(OUT_DIM, 128)

    keys = jax.random.split(key, 6 + NUM_LAYERS * 6)
    params = {
        "pre_win": _pad2(w(keys[0], WIN_IN, H), WIN_KP, H).astype(jnp.bfloat16),
        "pre_exp": _pad2(w(keys[1], EXP_IN, H), EXP_KP, H).astype(jnp.bfloat16),
        "post": w(keys[2], H, H).astype(jnp.bfloat16),
        "lin_w": _pad2(w(keys[3], H, OUT_DIM), H, OUT_NP).astype(jnp.bfloat16),
        "lin_b": jnp.zeros((1, OUT_NP), jnp.float32).at[0, :OUT_DIM].set(
            0.01 * jax.random.normal(keys[4], (OUT_DIM,), jnp.float32)),
        "zero_b": jnp.zeros((1, H), jnp.float32),   # bias=False layers
        "convs": [],
    }
    ki = 6
    for _ in range(NUM_LAYERS):
        wl, wr, bl = [], [], []
        for _rel in range(2):   # 0: ('window','near','window'), 1: ('example','close','example')
            wl.append(w(keys[ki], H, H))
            bl.append(0.01 * jax.random.normal(keys[ki + 1], (H,), jnp.float32))
            wr.append(w(keys[ki + 2], H, H))
            ki += 3
        params["convs"].append({
            "wl": jnp.stack(wl).astype(jnp.bfloat16),   # [2, H, H]
            "wr": jnp.stack(wr).astype(jnp.bfloat16),   # [2, H, H]
            "b": jnp.stack(bl)[:, None, :],             # [2, 1, H] f32
        })
    return params


# ----------------------------------------------------------------------------
# Forward pass (mirrors HeteroGNN.forward)
# ----------------------------------------------------------------------------
def hetero_gnn_forward(params, x_dict, edge_index_dict):
    n_win = x_dict["window"].shape[0]
    n_exp = x_dict["example"].shape[0]
    NP = _round_up(max(n_win, n_exp), 16)        # shared padded node count

    WIN_KP = params["pre_win"].shape[0]
    EXP_KP = params["pre_exp"].shape[0]

    # Pad node features once; activations carried in bf16 (f32 accumulation inside kernels).
    x_win = jnp.zeros((NP, WIN_KP), jnp.bfloat16).at[:n_win, :WIN_IN].set(
        x_dict["window"].astype(jnp.bfloat16))
    x_exp = jnp.zeros((NP, EXP_KP), jnp.bfloat16).at[:n_exp, :EXP_IN].set(
        x_dict["example"].astype(jnp.bfloat16))

    # pretransform -> LeakyReLU -> post_transform -> LeakyReLU  (activation fused in matmul)
    h_win = pallas_linear(x_win, params["pre_win"], params["zero_b"], alpha=LEAKY_ALPHA)
    h_win = pallas_linear(h_win, params["post"], params["zero_b"], alpha=LEAKY_ALPHA)
    h_exp = pallas_linear(x_exp, params["pre_exp"], params["zero_b"], alpha=LEAKY_ALPHA)
    h_exp = pallas_linear(h_exp, params["post"], params["zero_b"], alpha=LEAKY_ALPHA)

    # TODO(synk): x_dict['example_y'] = pretransform_ey(x_dict['example'][:, -250:]) only
    # feeds the EGBBlock ('example','refer','window') relation, which is not defined in the
    # provided source; the (dead) matmul is skipped entirely.

    # Row-normalized dense adjacency (A @ x == scatter_mean), built once, padded to NP.
    adj = jnp.stack([
        dense_mean_adj(edge_index_dict[("window", "near", "window")], NP),
        dense_mean_adj(edge_index_dict[("example", "close", "example")], NP),
    ])                                           # [2, NP, NP] bf16

    h = jnp.stack([h_win, h_exp])                # [2, NP, H] bf16
    for layer in params["convs"]:
        # HeteroConv(aggr='mean') with one SAGEConv per relation; LeakyReLU fused.
        h = pallas_hetero_sage(adj, h, layer["wl"], layer["wr"], layer["b"], LEAKY_ALPHA)

    # TODO(synk): CSRA pooling module is not defined in the provided source; window node
    # features pass through unchanged.
    pooled = h[0]                                # [NP, H]

    out = pallas_linear(pooled, params["lin_w"], params["lin_b"], alpha=None,
                        out_dtype=jnp.float32)
    return out[:n_win, :OUT_DIM]


# ----------------------------------------------------------------------------
if __name__ == "__main__":
    key = jax.random.PRNGKey(0)
    k_par, k_win, k_exp = jax.random.split(key, 3)

    N_WIN, N_EXP = 16, 8
    params = init_params(k_par)

    x_dict = {
        "window": jax.random.normal(k_win, (N_WIN, WIN_IN), jnp.float32),
        "example": jax.random.normal(k_exp, (N_EXP, EXP_IN), jnp.float32),
    }

    # simple ring graphs (bidirectional) as synthetic edge indices
    wi = jnp.arange(N_WIN, dtype=jnp.int32)
    ei = jnp.arange(N_EXP, dtype=jnp.int32)
    edge_index_dict = {
        ("window", "near", "window"): (
            jnp.concatenate([wi, (wi + 1) % N_WIN]),
            jnp.concatenate([(wi + 1) % N_WIN, wi]),
        ),
        ("example", "close", "example"): (
            jnp.concatenate([ei, (ei + 1) % N_EXP]),
            jnp.concatenate([(ei + 1) % N_EXP, ei]),
        ),
    }

    out = hetero_gnn_forward(params, x_dict, edge_index_dict)
    out = jax.block_until_ready(out)
    assert out.shape == (N_WIN, OUT_DIM), out.shape
    assert bool(jnp.all(jnp.isfinite(out)))
    print("KERNEL_OK")
</pallas_src>

<mosaic_0001>
module attributes {stable_mosaic.version = 11 : i64} {
  func.func @_linear_kernel(%arg0: i32, %arg1: memref<16x2048xbf16, #tpu.memory_space<vmem>>, %arg2: memref<2048x512xbf16, #tpu.memory_space<vmem>>, %arg3: memref<1x512xf32, #tpu.memory_space<vmem>>, %arg4: memref<16x512xbf16, #tpu.memory_space<vmem>>) attributes {dimension_semantics = [#tpu.dimension_semantics<arbitrary>], iteration_bounds = array<i64: 1>, scalar_prefetch = 0 : i64, scratch_operands = 0 : i64, tpu.core_type = #tpu.core_type<tc>, window_params = [{pipeline_mode = #tpu.pipeline_mode<synchronous>, transform_indices = @transform_0, window_bounds = array<i64: 16, 2048>}, {pipeline_mode = #tpu.pipeline_mode<synchronous>, transform_indices = @transform_1, window_bounds = array<i64: 2048, 512>}, {pipeline_mode = #tpu.pipeline_mode<synchronous>, transform_indices = @transform_2, window_bounds = array<i64: 1, 512>}, {pipeline_mode = #tpu.pipeline_mode<synchronous>, transform_indices = @transform_3, window_bounds = array<i64: 16, 512>}]} {
    %c0 = arith.constant 0 : index
    %c0_0 = arith.constant 0 : index
    %0 = vector.load %arg1[%c0, %c0_0] : memref<16x2048xbf16, #tpu.memory_space<vmem>>, vector<16x2048xbf16>
    %c0_1 = arith.constant 0 : index
    %c0_2 = arith.constant 0 : index
    %1 = vector.load %arg2[%c0_1, %c0_2] : memref<2048x512xbf16, #tpu.memory_space<vmem>>, vector<2048x512xbf16>
    %cst = arith.constant dense<0.000000e+00> : vector<16x512xf32>
    %2 = tpu.matmul %0, %1, %cst {dimension_numbers = #tpu.dot_dimension_numbers<[1], [0], [0], [1], [0, 0, 1, 1], [], []>} : vector<16x2048xbf16>, vector<2048x512xbf16>, vector<16x512xf32> -> vector<16x512xf32>
    %c0_3 = arith.constant 0 : index
    %c0_4 = arith.constant 0 : index
    %3 = vector.load %arg3[%c0_3, %c0_4] : memref<1x512xf32, #tpu.memory_space<vmem>>, vector<1x512xf32>
    %4 = vector.broadcast %3 : vector<1x512xf32> to vector<16x512xf32>
    %5 = arith.addf %2, %4 : vector<16x512xf32>
    %cst_5 = arith.constant 0.000000e+00 : f32
    %6 = vector.broadcast %cst_5 : f32 to vector<16x512xf32>
    %7 = arith.cmpf oge, %5, %6 : vector<16x512xf32>
    %cst_6 = arith.constant 2.000000e-01 : f32
    %8 = vector.broadcast %cst_6 : f32 to vector<16x512xf32>
    %9 = arith.mulf %8, %5 : vector<16x512xf32>
    %10 = arith.select %7, %5, %9 : vector<16x512xi1>, vector<16x512xf32>
    %11 = arith.truncf %10 : vector<16x512xf32> to vector<16x512xbf16>
    %c0_7 = arith.constant 0 : index
    %c0_8 = arith.constant 0 : index
    %12 = vector.load %arg4[%c0_7, %c0_8] : memref<16x512xbf16, #tpu.memory_space<vmem>>, vector<16x512xbf16>
    tpu.vector_store %arg4[%c0_7, %c0_8], %11 {strides = array<i32>} : memref<16x512xbf16, #tpu.memory_space<vmem>>, vector<16x512xbf16>,
    return
  }
  func.func @transform_0(%arg0: i32) -> (i32, i32) {
    %c0_i32 = arith.constant 0 : i32
    %c0_i32_0 = arith.constant 0 : i32
    %c0_i32_1 = arith.constant 0 : i32
    return %c0_i32, %c0_i32_0 : i32, i32
  }
  func.func @transform_1(%arg0: i32) -> (i32, i32) {
    %c0_i32 = arith.constant 0 : i32
    %c0_i32_0 = arith.constant 0 : i32
    %c0_i32_1 = arith.constant 0 : i32
    return %c0_i32, %c0_i32_0 : i32, i32
  }
  func.func @transform_2(%arg0: i32) -> (i32, i32) {
    %c0_i32 = arith.constant 0 : i32
    %c0_i32_0 = arith.constant 0 : i32
    %c0_i32_1 = arith.constant 0 : i32
    return %c0_i32, %c0_i32_0 : i32, i32
  }
  func.func @transform_3(%arg0: i32) -> (i32, i32) {
    %c0_i32 = arith.constant 0 : i32
    %c0_i32_0 = arith.constant 0 : i32
    %c0_i32_1 = arith.constant 0 : i32
    return %c0_i32, %c0_i32_0 : i32, i32
  }
}

</mosaic_0001>

<bundles_post_ra>
// kernel: tpu_custom_call.1
= control target key start
LH: loop header
LB: loop body
LE: loop exit
PB: predicated region body
PF: predicated region fallthrough
CT: control target
= control target key end

     0   :  { %8 = vsyncpa [#allocation3], 0  ;;  %s5610_s0 = inlined_call_operand.hbm [shape: bf16[16,2048], index: 0, kind: input, shape index: {}]   ;;  %s5611_s1 = inlined_call_operand.hbm [shape: bf16[2048,512], index: 1, kind: input, shape index: {}]   ;;  %s5612_s2 = inlined_call_operand.hbm [shape: f32[1,512], index: 2, kind: input, shape index: {}]   ;;  %s5613_s3 = inlined_call_operand.hbm [shape: bf16[16,512], index: 3, kind: output, shape index: {}]  }
   0x1   :  { %9 = vsyncpa [#allocation6], 0 }
   0x2   :  { %10 = vsyncpa [#allocation4], 0  ;;  %s5472_s12 = smov [#allocation5]   ;;  %s5378_s16 = scalar_lea.hbm %s5611_s1, 65536 }
   0x3   :  { %s28_s13 = sshll.u32 %s5472_s12, 4  ;;  %p5379_p0 = scmp.ne.s32.totalorder %s5611_s1, %s5378_s16  ;;  %s29_s13 = int_to_ptr.vmem [resolvable:$true] %s28_s13 }
   0x4   :  { %p5382_p1 = scmp.lt.u32.totalorder %s5378_s16, %s5611_s1 }
   0x6   :  { %p5384_p2 = pnand %p5382_p1, %p5379_p0 }
   0x8   :  { %5387 = shalt.err (!%p5384_p2)
}
   0x9   :  { %s5388_s21 = scalar_lea.vmem %s29_s13, 65536  ;;  %p5393_p4 = scmp.lt.s32.totalorder %s29_s13, %s29_s13 }
   0xa   :  { %p5389_p3 = scmp.ne.s32.totalorder %s29_s13, %s5388_s21  ;;  %p5394_p5 = scmp.lt.s32.totalorder %s5388_s21, %s5388_s21 }
   0xc   :  { %p5395_p6 = por %p5394_p5, %p5393_p4 }
   0xe   :  { %p5396_p7 = pnand %p5395_p6, %p5389_p3 }
  0x10   :  { %5399 = shalt.err (!%p5396_p7)
}
  0x11   :  { %s5473_s22 = smov 256   ;;  %s5474_s23 = smov 16  }
  0x12   :  { %34 = dma.hbm_to_vmem [thread:$0]  %s5611_s1, 65536, %s29_s13, [#allocation6], %s5473_s22, %s5473_s22, %s5474_s23  }
  0x13   :  { %s5475_s26 = smov [#allocation2]   ;;  %s5400_s30 = scalar_lea.hbm %s5610_s0, 2048 }
  0x14   :  { %s16_s27 = sshll.u32 %s5475_s26, 4  ;;  %p5401_p8 = scmp.ne.s32.totalorder %s5610_s0, %s5400_s30  ;;  %s17_s27 = int_to_ptr.vmem [resolvable:$true] %s16_s27 }
  0x15   :  { %p5404_p9 = scmp.lt.u32.totalorder %s5400_s30, %s5610_s0 }
  0x17   :  { %p5406_p10 = pnand %p5404_p9, %p5401_p8 }
  0x19   :  { %5409 = shalt.err (!%p5406_p10)
}
  0x1a   :  { %s5410_s8 = scalar_lea.vmem %s17_s27, 2048  ;;  %p5415_p12 = scmp.lt.s32.totalorder %s17_s27, %s17_s27 }
  0x1b   :  { %p5411_p11 = scmp.ne.s32.totalorder %s17_s27, %s5410_s8  ;;  %p5416_p13 = scmp.lt.s32.totalorder %s5410_s8, %s5410_s8 }
  0x1d   :  { %p5417_p0 = por %p5416_p13, %p5415_p12 }
  0x1f   :  { %p5418_p1 = pnand %p5417_p0, %p5411_p11 }
  0x21   :  { %5421 = shalt.err (!%p5418_p1)
}
  0x22   :  { %s5476_s1 = smov 1024   ;;  %s5477_s9 = smov 64  }
  0x23   :  { %22 = dma.hbm_to_vmem [thread:$0]  %s5610_s0, 2048, %s17_s27, [#allocation3], %s5476_s1, %s5476_s1, %s5477_s9  }
  0x24   :  { %s5478_s12 = smov [#allocation7]   ;;  %s5422_s16 = scalar_lea.hbm %s5612_s2, 64 }
  0x25   :  { %s41_s13 = sshll.u32 %s5478_s12, 4  ;;  %p5423_p2 = scmp.ne.s32.totalorder %s5612_s2, %s5422_s16  ;;  %s42_s13 = int_to_ptr.vmem [resolvable:$true] %s41_s13 }
  0x26   :  { %p5426_p3 = scmp.lt.u32.totalorder %s5422_s16, %s5612_s2 }
  0x28   :  { %p5428_p4 = pnand %p5426_p3, %p5423_p2 }
  0x2a   :  { %5431 = shalt.err (!%p5428_p4)
}
  0x2b   :  { %s5432_s21 = scalar_lea.vmem %s42_s13, 64  ;;  %p5437_p6 = scmp.lt.s32.totalorder %s42_s13, %s42_s13 }
  0x2c   :  { %p5433_p5 = scmp.ne.s32.totalorder %s42_s13, %s5432_s21  ;;  %p5438_p7 = scmp.lt.s32.totalorder %s5432_s21, %s5432_s21 }
  0x2e   :  { %p5439_p8 = por %p5438_p7, %p5437_p6 }
  0x30   :  { %p5440_p9 = pnand %p5439_p8, %p5433_p5 }
  0x32   :  { %5443 = shalt.err (!%p5440_p9)
}
  0x33   :  { %44 = dma.hbm_to_vmem [thread:$0]  %s5612_s2, 64, %s42_s13, [#allocation6]  }
  0x34   :  { %5466 = dma.done.wait [#allocation3], 2048  }
  0x35   :  { %5467 = vsyncadd [#allocation3], 4294965248 }
  0x36   :  { %5468 = dma.done.wait [#allocation6], 65600  }
  0x37   :  { %5469 = vsyncadd [#allocation6], 4294901696  ;;  %v4610_v0 = vld [vmem:[#allocation5 + $0x4] ss:$16 sps:$4 sm:$0xff]   ;;  %v4612_v1 = vld [vmem:[#allocation5 + $0xc] ss:$16 sps:$4 sm:$0xff]  }
  0x38   :  { %3244 = vmatprep.subr.bf16.mxu0 %v4610_v0  ;;  %v4614_v2 = vld [vmem:[#allocation5] ss:$16 sps:$4 sm:$0xff]   ;;  %v4615_v3 = vld [vmem:[#allocation5 + $0x8] ss:$16 sps:$4 sm:$0xff]   ;;  %3588 = vmatprep.subr.bf16.mxu1 %v4612_v1  ;;  %v4616_v4 = vld [vmem:[#allocation5 + $0x24] ss:$16 sps:$4 sm:$0xff]  }
  0x39   :  { %3245 = vmatpush1.bf16.msra.mxu0 %v4614_v2  ;;  %3589 = vmatpush1.bf16.msra.mxu1 %v4615_v3  ;;  %v4618_v5 = vld [vmem:[#allocation5 + $0x2c] ss:$16 sps:$4 sm:$0xff]   ;;  %v4620_v6 = vld [vmem:[#allocation5 + $0x20] ss:$16 sps:$4 sm:$0xff]   ;;  %v4621_v7 = vld [vmem:[#allocation5 + $0x28] ss:$16 sps:$4 sm:$0xff]  }
  0x3a   :  { %3246 = vmatprep.subr.bf16.mxu0 %v4616_v4  ;;  %3590 = vmatprep.subr.bf16.mxu1 %v4618_v5  ;;  %v4622_v8 = vld [vmem:[#allocation5 + $0x44] ss:$16 sps:$4 sm:$0xff]   ;;  %v4624_v9 = vld [vmem:[#allocation5 + $0x4c] ss:$16 sps:$4 sm:$0xff]   ;;  %v4626_v10 = vld [vmem:[#allocation5 + $0x40] ss:$16 sps:$4 sm:$0xff]  }
  0x3b   :  { %v4627_v11 = vld [vmem:[#allocation5 + $0x48] ss:$16 sps:$4 sm:$0xff]   ;;  %v4628_v12 = vld [vmem:[#allocation5 + $0x64] ss:$16 sps:$4 sm:$0xff]   ;;  %v4630_v13 = vld [vmem:[#allocation5 + $0x6c] ss:$16 sps:$4 sm:$0xff]  }
  0x3c   :  { %v4632_v14 = vld [vmem:[#allocation5 + $0x60] ss:$16 sps:$4 sm:$0xff]   ;;  %v4633_v15 = vld [vmem:[#allocation5 + $0x68] ss:$16 sps:$4 sm:$0xff]   ;;  %v4634_v16 = vld [vmem:[#allocation5 + $0x84] ss:$16 sps:$4 sm:$0xff]  }
  0x3d   :  { %3247 = vmatpush1.bf16.msra.mxu0 %v4620_v6  ;;  %3591 = vmatpush1.bf16.msra.mxu1 %v4621_v7  ;;  %v4636_v17 = vld [vmem:[#allocation5 + $0x8c] ss:$16 sps:$4 sm:$0xff]   ;;  %v4638_v18 = vld [vmem:[#allocation5 + $0x80] ss:$16 sps:$4 sm:$0xff]   ;;  %v4639_v19 = vld [vmem:[#allocation5 + $0x88] ss:$16 sps:$4 sm:$0xff]  }
  0x3e   :  { %3248 = vmatprep.subr.bf16.mxu0 %v4622_v8  ;;  %3592 = vmatprep.subr.bf16.mxu1 %v4624_v9  ;;  %v4640_v20 = vld [vmem:[#allocation5 + $0xa4] ss:$16 sps:$4 sm:$0xff]   ;;  %v4642_v21 = vld [vmem:[#allocation5 + $0xac] ss:$16 sps:$4 sm:$0xff]   ;;  %v4644_v22 = vld [vmem:[#allocation5 + $0xa0] ss:$16 sps:$4 sm:$0xff]  }
  0x3f   :  { %v4645_v23 = vld [vmem:[#allocation5 + $0xa8] ss:$16 sps:$4 sm:$0xff]   ;;  %v4646_v24 = vld [vmem:[#allocation5 + $0xc4] ss:$16 sps:$4 sm:$0xff]   ;;  %v4648_v25 = vld [vmem:[#allocation5 + $0xcc] ss:$16 sps:$4 sm:$0xff]  }
  0x40   :  { %v4650_v26 = vld [vmem:[#allocation5 + $0xc0] ss:$16 sps:$4 sm:$0xff]   ;;  %v4651_v27 = vld [vmem:[#allocation5 + $0xc8] ss:$16 sps:$4 sm:$0xff]   ;;  %v4652_v28 = vld [vmem:[#allocation5 + $0xe4] ss:$16 sps:$4 sm:$0xff]  }
  0x41   :  { %3249 = vmatpush1.bf16.msra.mxu0 %v4626_v10  ;;  %3593 = vmatpush1.bf16.msra.mxu1 %v4627_v11  ;;  %v4654_v29 = vld [vmem:[#allocation5 + $0xec] ss:$16 sps:$4 sm:$0xff]   ;;  %v4656_v30 = vld [vmem:[#allocation5 + $0xe0] ss:$16 sps:$4 sm:$0xff]   ;;  %v4657_v31 = vld [vmem:[#allocation5 + $0xe8] ss:$16 sps:$4 sm:$0xff]  }
  0x42   :  { %3250 = vmatprep.subr.bf16.mxu0 %v4628_v12  ;;  %3594 = vmatprep.subr.bf16.mxu1 %v4630_v13  ;;  %v4658_v32 = vld [vmem:[#allocation5 + $0x104] ss:$16 sps:$4 sm:$0xff]   ;;  %v4660_v33 = vld [vmem:[#allocation5 + $0x10c] ss:$16 sps:$4 sm:$0xff]   ;;  %v4662_v34 = vld [vmem:[#allocation5 + $0x100] ss:$16 sps:$4 sm:$0xff]  }
  0x43   :  { %v4663_v35 = vld [vmem:[#allocation5 + $0x108] ss:$16 sps:$4 sm:$0xff]   ;;  %v4664_v36 = vld [vmem:[#allocation5 + $0x124] ss:$16 sps:$4 sm:$0xff]   ;;  %v4666_v37 = vld [vmem:[#allocation5 + $0x12c] ss:$16 sps:$4 sm:$0xff]  }
  0x44   :  { %v4668_v38 = vld [vmem:[#allocation5 + $0x120] ss:$16 sps:$4 sm:$0xff]   ;;  %v4669_v39 = vld [vmem:[#allocation5 + $0x128] ss:$16 sps:$4 sm:$0xff]   ;;  %v4670_v40 = vld [vmem:[#allocation5 + $0x144] ss:$16 sps:$4 sm:$0xff]  }
  0x45   :  { %3251 = vmatpush1.bf16.msra.mxu0 %v4632_v14  ;;  %3595 = vmatpush1.bf16.msra.mxu1 %v4633_v15  ;;  %v4672_v41 = vld [vmem:[#allocation5 + $0x14c] ss:$16 sps:$4 sm:$0xff]   ;;  %v4674_v42 = vld [vmem:[#allocation5 + $0x140] ss:$16 sps:$4 sm:$0xff]   ;;  %v4675_v43 = vld [vmem:[#allocation5 + $0x148] ss:$16 sps:$4 sm:$0xff]  }
  0x46   :  { %3252 = vmatprep.subr.bf16.mxu0 %v4634_v16  ;;  %3596 = vmatprep.subr.bf16.mxu1 %v4636_v17  ;;  %v4676_v44 = vld [vmem:[#allocation5 + $0x164] ss:$16 sps:$4 sm:$0xff]   ;;  %v4678_v45 = vld [vmem:[#allocation5 + $0x16c] ss:$16 sps:$4 sm:$0xff]   ;;  %v4680_v48 = vld [vmem:[#allocation5 + $0x160] ss:$16 sps:$4 sm:$0xff]  }
  0x47   :  { %v54_v46 = vld [vmem:[#allocation2] sm:$0xff]  ;;  %v4681_v49 = vld [vmem:[#allocation5 + $0x168] ss:$16 sps:$4 sm:$0xff]   ;;  %v4684_v52 = vld [vmem:[#allocation5 + $0x18c] ss:$16 sps:$4 sm:$0xff]   ;;  %s5479_s2 = smov [#allocation8]  }
  0x48   :  { %v62_v47 = vld [vmem:[#allocation2 + $0x40] sm:$0xff]  ;;  %v4687_v54 = vld [vmem:[#allocation5 + $0x188] ss:$16 sps:$4 sm:$0xff]   ;;  %v4690_v56 = vld [vmem:[#allocation5 + $0x1ac] ss:$16 sps:$4 sm:$0xff]   ;;  %s3989_s25 = sshll.u32 %s5479_s2, 4  ;;  %s3990_s25 = int_to_ptr.vmem [resolvable:$true] %s3989_s25 }
  0x49   :  { %3253 = vmatpush1.bf16.msra.mxu0 %v4638_v18  ;;  %3597 = vmatpush1.bf16.msra.mxu1 %v4639_v19  ;;  %v4003_v50 = vcombine.high %v54_v46, %v62_v47  ;;  %v4682_v51 = vld [vmem:[#allocation5 + $0x184] ss:$16 sps:$4 sm:$0xff]   ;;  %v4686_v53 = vld [vmem:[#allocation5 + $0x180] ss:$16 sps:$4 sm:$0xff]   ;;  %v4693_v58 = vld [vmem:[#allocation5 + $0x1a8] ss:$16 sps:$4 sm:$0xff]   ;;  %v4002_v5 = vcombine.low %v54_v46, %v62_v47  ;;  %p5449_p11 = scmp.lt.s32.totalorder %s3990_s25, %s3990_s25 }
  0x4a   :  { %3254 = vmatprep.subr.bf16.mxu0 %v4640_v20  ;;  %3598 = vmatprep.subr.bf16.mxu1 %v4642_v21  ;;  %v4688_v55 = vld [vmem:[#allocation5 + $0x1a4] ss:$16 sps:$4 sm:$0xff]   ;;  %v4692_v57 = vld [vmem:[#allocation5 + $0x1a0] ss:$16 sps:$4 sm:$0xff]   ;;  %v4696_v60 = vld [vmem:[#allocation5 + $0x1cc] ss:$16 sps:$4 sm:$0xff]  }
  0x4b   :  { %3276 = vmatprep.mubr.bf16.mxu0 %v4003_v50  ;;  %3620 = vmatprep.mubr.bf16.mxu1 %v4003_v50  ;;  %v4694_v59 = vld [vmem:[#allocation5 + $0x1c4] ss:$16 sps:$4 sm:$0xff]   ;;  %v4698_v61 = vld [vmem:[#allocation5 + $0x1c0] ss:$16 sps:$4 sm:$0xff]   ;;  %v4699_v62 = vld [vmem:[#allocation5 + $0x1c8] ss:$16 sps:$4 sm:$0xff]  }
  0x4c   :  { %v4700_v63 = vld [vmem:[#allocation5 + $0x1e4] ss:$16 sps:$4 sm:$0xff]   ;;  %v4702_v0 = vld [vmem:[#allocation5 + $0x1ec] ss:$16 sps:$4 sm:$0xff]   ;;  %v4704_v1 = vld [vmem:[#allocation5 + $0x1e0] ss:$16 sps:$4 sm:$0xff]  }
  0x4d   :  { %3255 = vmatpush1.bf16.msra.mxu0 %v4644_v22  ;;  %3599 = vmatpush1.bf16.msra.mxu1 %v4645_v23  ;;  %v4705_v2 = vld [vmem:[#allocation5 + $0x1e8] ss:$16 sps:$4 sm:$0xff]   ;;  %v4708_v3 = vld [vmem:[#allocation5 + $0x204] ss:$16 sps:$4 sm:$0xff]   ;;  %v4711_v4 = vld [vmem:[#allocation5 + $0x20c] ss:$16 sps:$4 sm:$0xff]  }
  0x4e   :  { %3256 = vmatprep.subr.bf16.mxu0 %v4646_v24  ;;  %3600 = vmatprep.subr.bf16.mxu1 %v4648_v25  ;;  %v4706_v6 = vld [vmem:[#allocation5 + $0x200] ss:$16 sps:$4 sm:$0xff]   ;;  %v4709_v7 = vld [vmem:[#allocation5 + $0x208] ss:$16 sps:$4 sm:$0xff]   ;;  %v4714_v8 = vld [vmem:[#allocation5 + $0x224] ss:$16 sps:$4 sm:$0xff]  }
  0x4f   :  { %v4717_v9 = vld [vmem:[#allocation5 + $0x22c] ss:$16 sps:$4 sm:$0xff]   ;;  %v4712_v10 = vld [vmem:[#allocation5 + $0x220] ss:$16 sps:$4 sm:$0xff]   ;;  %v4715_v11 = vld [vmem:[#allocation5 + $0x228] ss:$16 sps:$4 sm:$0xff]  }
  0x50   :  { %v4720_v12 = vld [vmem:[#allocation5 + $0x244] ss:$16 sps:$4 sm:$0xff]   ;;  %v4723_v13 = vld [vmem:[#allocation5 + $0x24c] ss:$16 sps:$4 sm:$0xff]   ;;  %v4718_v14 = vld [vmem:[#allocation5 + $0x240] ss:$16 sps:$4 sm:$0xff]  }
  0x51   :  { %3257 = vmatpush1.bf16.msra.mxu0 %v4650_v26  ;;  %3601 = vmatpush1.bf16.msra.mxu1 %v4651_v27  ;;  %v4721_v15 = vld [vmem:[#allocation5 + $0x248] ss:$16 sps:$4 sm:$0xff]   ;;  %v4726_v16 = vld [vmem:[#allocation5 + $0x264] ss:$16 sps:$4 sm:$0xff]   ;;  %v4729_v17 = vld [vmem:[#allocation5 + $0x26c] ss:$16 sps:$4 sm:$0xff]  }
  0x52   :  { %3258 = vmatprep.subr.bf16.mxu0 %v4652_v28  ;;  %3602 = vmatprep.subr.bf16.mxu1 %v4654_v29  ;;  %v4724_v18 = vld [vmem:[#allocation5 + $0x260] ss:$16 sps:$4 sm:$0xff]   ;;  %v4727_v19 = vld [vmem:[#allocation5 + $0x268] ss:$16 sps:$4 sm:$0xff]   ;;  %v4732_v20 = vld [vmem:[#allocation5 + $0x284] ss:$16 sps:$4 sm:$0xff]  }
  0x53   :  { %v4735_v21 = vld [vmem:[#allocation5 + $0x28c] ss:$16 sps:$4 sm:$0xff]   ;;  %v4730_v22 = vld [vmem:[#allocation5 + $0x280] ss:$16 sps:$4 sm:$0xff]   ;;  %v4733_v23 = vld [vmem:[#allocation5 + $0x288] ss:$16 sps:$4 sm:$0xff]  }
  0x54   :  { %v4738_v24 = vld [vmem:[#allocation5 + $0x2a4] ss:$16 sps:$4 sm:$0xff]   ;;  %v4741_v25 = vld [vmem:[#allocation5 + $0x2ac] ss:$16 sps:$4 sm:$0xff]   ;;  %v4736_v26 = vld [vmem:[#allocation5 + $0x2a0] ss:$16 sps:$4 sm:$0xff]  }
  0x55   :  { %3259 = vmatpush1.bf16.msra.mxu0 %v4656_v30  ;;  %3603 = vmatpush1.bf16.msra.mxu1 %v4657_v31  ;;  %v4739_v27 = vld [vmem:[#allocation5 + $0x2a8] ss:$16 sps:$4 sm:$0xff]   ;;  %v4744_v28 = vld [vmem:[#allocation5 + $0x2c4] ss:$16 sps:$4 sm:$0xff]   ;;  %v4747_v29 = vld [vmem:[#allocation5 + $0x2cc] ss:$16 sps:$4 sm:$0xff]  }
  0x56   :  { %3260 = vmatprep.subr.bf16.mxu0 %v4658_v32  ;;  %3604 = vmatprep.subr.bf16.mxu1 %v4660_v33  ;;  %v5539_v30 = vld [vmem:[#allocation2 + $0x8] sm:$0xff]  ;;  %v4742_v32 = vld [vmem:[#allocation5 + $0x2c0] ss:$16 sps:$4 sm:$0xff]   ;;  %v4768_v47 = vld [vmem:[#allocation5 + $0x344] ss:$16 sps:$4 sm:$0xff]   ;;  %s5444_s26 = scalar_lea.vmem %s3990_s25, 512 }
  0x57   :  { %v5541_v31 = vld [vmem:[#allocation2 + $0x48] sm:$0xff]  ;;  %p5445_p10 = scmp.ne.s32.totalorder %s3990_s25, %s5444_s26  ;;  %p5450_p12 = scmp.lt.s32.totalorder %s5444_s26, %s5444_s26 }
  0x58   :  { %v4745_v33 = vld [vmem:[#allocation5 + $0x2c8] ss:$16 sps:$4 sm:$0xff]  }
  0x59   :  { %3261 = vmatpush1.bf16.msra.mxu0 %v4662_v34  ;;  %3605 = vmatpush1.bf16.msra.mxu1 %v4663_v35  ;;  %v4005_v34 = vcombine.high %v5539_v30, %v5541_v31  ;;  %v4750_v35 = vld [vmem:[#allocation5 + $0x2e4] ss:$16 sps:$4 sm:$0xff]   ;;  %v4763_v46 = vld [vmem:[#allocation5 + $0x328] ss:$16 sps:$4 sm:$0xff]   ;;  %p5451_p13 = por %p5450_p12, %p5449_p11 }
  0x5a   :  { %3262 = vmatprep.subr.bf16.mxu0 %v4664_v36  ;;  %3606 = vmatprep.subr.bf16.mxu1 %v4666_v37  ;;  %v4753_v36 = vld [vmem:[#allocation5 + $0x2ec] ss:$16 sps:$4 sm:$0xff]   ;;  %v4748_v37 = vld [vmem:[#allocation5 + $0x2e0] ss:$16 sps:$4 sm:$0xff]   ;;  %v4769_v50 = vld [vmem:[#allocation5 + $0x348] ss:$16 sps:$4 sm:$0xff]  }
  0x5b   :  { %p5452_p0 = pnand %p5451_p13, %p5445_p10 }
  0x5d   :  { %3263 = vmatpush1.bf16.msra.mxu0 %v4668_v38  ;;  %3607 = vmatpush1.bf16.msra.mxu1 %v4669_v39  ;;  %v4751_v38 = vld [vmem:[#allocation5 + $0x2e8] ss:$16 sps:$4 sm:$0xff]   ;;  %v4756_v39 = vld [vmem:[#allocation5 + $0x304] ss:$16 sps:$4 sm:$0xff]  }
  0x5e   :  { %3264 = vmatprep.subr.bf16.mxu0 %v4670_v40  ;;  %3608 = vmatprep.subr.bf16.mxu1 %v4672_v41  ;;  %v4759_v40 = vld [vmem:[#allocation5 + $0x30c] ss:$16 sps:$4 sm:$0xff]   ;;  %v4754_v41 = vld [vmem:[#allocation5 + $0x300] ss:$16 sps:$4 sm:$0xff]  }
  0x61   :  { %3265 = vmatpush1.bf16.msra.mxu0 %v4674_v42  ;;  %3609 = vmatpush1.bf16.msra.mxu1 %v4675_v43  ;;  %v4757_v42 = vld [vmem:[#allocation5 + $0x308] ss:$16 sps:$4 sm:$0xff]   ;;  %v4762_v43 = vld [vmem:[#allocation5 + $0x324] ss:$16 sps:$4 sm:$0xff]  }
  0x62   :  { %3266 = vmatprep.subr.bf16.mxu0 %v4676_v44  ;;  %3610 = vmatprep.subr.bf16.mxu1 %v4678_v45  ;;  %v4765_v44 = vld [vmem:[#allocation5 + $0x32c] ss:$16 sps:$4 sm:$0xff]   ;;  %v4760_v45 = vld [vmem:[#allocation5 + $0x320] ss:$16 sps:$4 sm:$0xff]  }
  0x65   :  { %3267 = vmatpush1.bf16.msra.mxu0 %v4680_v48  ;;  %3611 = vmatpush1.bf16.msra.mxu1 %v4681_v49  ;;  %v4771_v48 = vld [vmem:[#allocation5 + $0x34c] ss:$16 sps:$4 sm:$0xff]   ;;  %v4766_v49 = vld [vmem:[#allocation5 + $0x340] ss:$16 sps:$4 sm:$0xff]  }
  0x66   :  { %3268 = vmatprep.subr.bf16.mxu0 %v4682_v51  ;;  %3612 = vmatprep.subr.bf16.mxu1 %v4684_v52  ;;  %v4774_v51 = vld [vmem:[#allocation5 + $0x364] ss:$16 sps:$4 sm:$0xff]   ;;  %v4777_v52 = vld [vmem:[#allocation5 + $0x36c] ss:$16 sps:$4 sm:$0xff]  }
  0x69   :  { %3269 = vmatpush1.bf16.msra.mxu0 %v4686_v53  ;;  %3613 = vmatpush1.bf16.msra.mxu1 %v4687_v54  ;;  %v4772_v53 = vld [vmem:[#allocation5 + $0x360] ss:$16 sps:$4 sm:$0xff]   ;;  %v4775_v54 = vld [vmem:[#allocation5 + $0x368] ss:$16 sps:$4 sm:$0xff]  }
  0x6a   :  { %3270 = vmatprep.subr.bf16.mxu0 %v4688_v55  ;;  %3614 = vmatprep.subr.bf16.mxu1 %v4690_v56  ;;  %v4780_v55 = vld [vmem:[#allocation5 + $0x384] ss:$16 sps:$4 sm:$0xff]   ;;  %v4783_v56 = vld [vmem:[#allocation5 + $0x38c] ss:$16 sps:$4 sm:$0xff]  }
  0x6d   :  { %3271 = vmatpush1.bf16.msra.mxu0 %v4692_v57  ;;  %3615 = vmatpush1.bf16.msra.mxu1 %v4693_v58  ;;  %v4778_v57 = vld [vmem:[#allocation5 + $0x380] ss:$16 sps:$4 sm:$0xff]   ;;  %v4781_v58 = vld [vmem:[#allocation5 + $0x388] ss:$16 sps:$4 sm:$0xff]  }
  0x6e   :  { %3272 = vmatprep.subr.bf16.mxu0 %v4694_v59  ;;  %3616 = vmatprep.subr.bf16.mxu1 %v4696_v60  ;;  %v4786_v59 = vld [vmem:[#allocation5 + $0x3a4] ss:$16 sps:$4 sm:$0xff]   ;;  %v4789_v60 = vld [vmem:[#allocation5 + $0x3ac] ss:$16 sps:$4 sm:$0xff]  }
  0x71   :  { %3273 = vmatpush1.bf16.msra.mxu0 %v4698_v61  ;;  %3617 = vmatpush1.bf16.msra.mxu1 %v4699_v62  ;;  %v4784_v61 = vld [vmem:[#allocation5 + $0x3a0] ss:$16 sps:$4 sm:$0xff]   ;;  %v4787_v62 = vld [vmem:[#allocation5 + $0x3a8] ss:$16 sps:$4 sm:$0xff]  }
  0x72   :  { %3274 = vmatprep.subr.bf16.mxu0 %v4700_v63  ;;  %3618 = vmatprep.subr.bf16.mxu1 %v4702_v0  ;;  %v4792_v63 = vld [vmem:[#allocation5 + $0x3c4] ss:$16 sps:$4 sm:$0xff]   ;;  %v4795_v0 = vld [vmem:[#allocation5 + $0x3cc] ss:$16 sps:$4 sm:$0xff]  }
  0x75   :  { %3275 = vmatpush1.bf16.msra.mxu0 %v4704_v1  ;;  %3619 = vmatpush1.bf16.msra.mxu1 %v4705_v2  ;;  %v4790_v1 = vld [vmem:[#allocation5 + $0x3c0] ss:$16 sps:$4 sm:$0xff]   ;;  %v4793_v2 = vld [vmem:[#allocation5 + $0x3c8] ss:$16 sps:$4 sm:$0xff]  }
  0x76   :  { %3287 = vmatprep.subr.bf16.mxu0 %v4708_v3  ;;  %3631 = vmatprep.subr.bf16.mxu1 %v4711_v4  ;;  %v4798_v3 = vld [vmem:[#allocation5 + $0x3e4] ss:$16 sps:$4 sm:$0xff]   ;;  %v4801_v4 = vld [vmem:[#allocation5 + $0x3ec] ss:$16 sps:$4 sm:$0xff]  }
  0x78   :  { %3277 = vmatmul.mubr.bf16.vlgmr.msra.gmra.mrb[0].mxu0 %v4002_v5  ;;  %3621 = vmatmul.mubr.bf16.vlgmr.msra.gmra.mrb[0].mxu1 %v4002_v5  ;;  %v4796_v5 = vld [vmem:[#allocation5 + $0x3e0] ss:$16 sps:$4 sm:$0xff]  }
  0x79   :  { %3288 = vmatpush1.bf16.msra.mxu0 %v4706_v6  ;;  %3632 = vmatpush1.bf16.msra.mxu1 %v4709_v7  ;;  %v4799_v6 = vld [vmem:[#allocation5 + $0x3e8] ss:$16 sps:$4 sm:$0xff]   ;;  %v4804_v7 = vld [vmem:[#allocation5 + $0x404] ss:$16 sps:$4 sm:$0xff]  }
  0x7a   :  { %3289 = vmatprep.subr.bf16.mxu0 %v4714_v8  ;;  %3633 = vmatprep.subr.bf16.mxu1 %v4717_v9  ;;  %v4807_v8 = vld [vmem:[#allocation5 + $0x40c] ss:$16 sps:$4 sm:$0xff]   ;;  %v4004_v9 = vcombine.low %v5539_v30, %v5541_v31  ;;  %v4829_v30 = vld [vmem:[#allocation5 + $0x488] ss:$16 sps:$4 sm:$0xff]   ;;  %v4834_v31 = vld [vmem:[#allocation5 + $0x4a4] ss:$16 sps:$4 sm:$0xff]  }
  0x7b   :  { %3319 = vmatprep.mubr.bf16.mxu0 %v4005_v34  ;;  %3663 = vmatprep.mubr.bf16.mxu1 %v4005_v34  ;;  %v4835_v34 = vld [vmem:[#allocation5 + $0x4a8] ss:$16 sps:$4 sm:$0xff]  }
  0x7d   :  { %3290 = vmatpush1.bf16.msra.mxu0 %v4712_v10  ;;  %3634 = vmatpush1.bf16.msra.mxu1 %v4715_v11  ;;  %v4802_v10 = vld [vmem:[#allocation5 + $0x400] ss:$16 sps:$4 sm:$0xff]   ;;  %v4805_v11 = vld [vmem:[#allocation5 + $0x408] ss:$16 sps:$4 sm:$0xff]  }
  0x7e   :  { %3291 = vmatprep.subr.bf16.mxu0 %v4720_v12  ;;  %3635 = vmatprep.subr.bf16.mxu1 %v4723_v13  ;;  %v4810_v12 = vld [vmem:[#allocation5 + $0x424] ss:$16 sps:$4 sm:$0xff]   ;;  %v4813_v13 = vld [vmem:[#allocation5 + $0x42c] ss:$16 sps:$4 sm:$0xff]  }
  0x81   :  { %3292 = vmatpush1.bf16.msra.mxu0 %v4718_v14  ;;  %3636 = vmatpush1.bf16.msra.mxu1 %v4721_v15  ;;  %v5547_v14 = vld [vmem:[#allocation2 + $0x10] sm:$0xff] }
  0x82   :  { %3293 = vmatprep.subr.bf16.mxu0 %v4726_v16  ;;  %3637 = vmatprep.subr.bf16.mxu1 %v4729_v17  ;;  %v5549_v15 = vld [vmem:[#allocation2 + $0x50] sm:$0xff] }
  0x83   :  { %v4007_v16 = vcombine.high %v5547_v14, %v5549_v15  ;;  %v4808_v17 = vld [vmem:[#allocation5 + $0x420] ss:$16 sps:$4 sm:$0xff]  }
  0x85   :  { %3294 = vmatpush1.bf16.msra.mxu0 %v4724_v18  ;;  %3638 = vmatpush1.bf16.msra.mxu1 %v4727_v19  ;;  %v4811_v18 = vld [vmem:[#allocation5 + $0x428] ss:$16 sps:$4 sm:$0xff]   ;;  %v4816_v19 = vld [vmem:[#allocation5 + $0x444] ss:$16 sps:$4 sm:$0xff]  }
  0x86   :  { %3295 = vmatprep.subr.bf16.mxu0 %v4732_v20  ;;  %3639 = vmatprep.subr.bf16.mxu1 %v4735_v21  ;;  %v4819_v20 = vld [vmem:[#allocation5 + $0x44c] ss:$16 sps:$4 sm:$0xff]   ;;  %v4814_v21 = vld [vmem:[#allocation5 + $0x440] ss:$16 sps:$4 sm:$0xff]  }
  0x89   :  { %3296 = vmatpush1.bf16.msra.mxu0 %v4730_v22  ;;  %3640 = vmatpush1.bf16.msra.mxu1 %v4733_v23  ;;  %v4817_v22 = vld [vmem:[#allocation5 + $0x448] ss:$16 sps:$4 sm:$0xff]   ;;  %v4822_v23 = vld [vmem:[#allocation5 + $0x464] ss:$16 sps:$4 sm:$0xff]  }
  0x8a   :  { %3297 = vmatprep.subr.bf16.mxu0 %v4738_v24  ;;  %3641 = vmatprep.subr.bf16.mxu1 %v4741_v25  ;;  %v4825_v24 = vld [vmem:[#allocation5 + $0x46c] ss:$16 sps:$4 sm:$0xff]   ;;  %v4820_v25 = vld [vmem:[#allocation5 + $0x460] ss:$16 sps:$4 sm:$0xff]  }
  0x8d   :  { %3298 = vmatpush1.bf16.msra.mxu0 %v4736_v26  ;;  %3642 = vmatpush1.bf16.msra.mxu1 %v4739_v27  ;;  %v4823_v26 = vld [vmem:[#allocation5 + $0x468] ss:$16 sps:$4 sm:$0xff]   ;;  %v4828_v27 = vld [vmem:[#allocation5 + $0x484] ss:$16 sps:$4 sm:$0xff]  }
  0x8e   :  { %3299 = vmatprep.subr.bf16.mxu0 %v4744_v28  ;;  %3643 = vmatprep.subr.bf16.mxu1 %v4747_v29  ;;  %v4831_v28 = vld [vmem:[#allocation5 + $0x48c] ss:$16 sps:$4 sm:$0xff]   ;;  %v4826_v29 = vld [vmem:[#allocation5 + $0x480] ss:$16 sps:$4 sm:$0xff]  }
  0x91   :  { %3300 = vmatpush1.bf16.msra.mxu0 %v4742_v32  ;;  %3644 = vmatpush1.bf16.msra.mxu1 %v4745_v33  ;;  %v4837_v32 = vld [vmem:[#allocation5 + $0x4ac] ss:$16 sps:$4 sm:$0xff]   ;;  %v4832_v33 = vld [vmem:[#allocation5 + $0x4a0] ss:$16 sps:$4 sm:$0xff]  }
  0x92   :  { %3301 = vmatprep.subr.bf16.mxu0 %v4750_v35  ;;  %3645 = vmatprep.subr.bf16.mxu1 %v4753_v36  ;;  %v4840_v35 = vld [vmem:[#allocation5 + $0x4c4] ss:$16 sps:$4 sm:$0xff]   ;;  %v4843_v36 = vld [vmem:[#allocation5 + $0x4cc] ss:$16 sps:$4 sm:$0xff]  }
  0x95   :  { %3302 = vmatpush1.bf16.msra.mxu0 %v4748_v37  ;;  %3646 = vmatpush1.bf16.msra.mxu1 %v4751_v38  ;;  %v4838_v37 = vld [vmem:[#allocation5 + $0x4c0] ss:$16 sps:$4 sm:$0xff]   ;;  %v4841_v38 = vld [vmem:[#allocation5 + $0x4c8] ss:$16 sps:$4 sm:$0xff]  }
  0x96   :  { %3303 = vmatprep.subr.bf16.mxu0 %v4756_v39  ;;  %3647 = vmatprep.subr.bf16.mxu1 %v4759_v40  ;;  %v4846_v39 = vld [vmem:[#allocation5 + $0x4e4] ss:$16 sps:$4 sm:$0xff]   ;;  %v4849_v40 = vld [vmem:[#allocation5 + $0x4ec] ss:$16 sps:$4 sm:$0xff]  }
  0x99   :  { %3304 = vmatpush1.bf16.msra.mxu0 %v4754_v41  ;;  %3648 = vmatpush1.bf16.msra.mxu1 %v4757_v42  ;;  %v4844_v41 = vld [vmem:[#allocation5 + $0x4e0] ss:$16 sps:$4 sm:$0xff]   ;;  %v4847_v42 = vld [vmem:[#allocation5 + $0x4e8] ss:$16 sps:$4 sm:$0xff]  }
  0x9a   :  { %3305 = vmatprep.subr.bf16.mxu0 %v4762_v43  ;;  %3649 = vmatprep.subr.bf16.mxu1 %v4765_v44  ;;  %v4852_v43 = vld [vmem:[#allocation5 + $0x504] ss:$16 sps:$4 sm:$0xff]   ;;  %v4855_v44 = vld [vmem:[#allocation5 + $0x50c] ss:$16 sps:$4 sm:$0xff]  }
  0x9d   :  { %3306 = vmatpush1.bf16.msra.mxu0 %v4760_v45  ;;  %3650 = vmatpush1.bf16.msra.mxu1 %v4763_v46  ;;  %v4850_v45 = vld [vmem:[#allocation5 + $0x500] ss:$16 sps:$4 sm:$0xff]   ;;  %v4853_v46 = vld [vmem:[#allocation5 + $0x508] ss:$16 sps:$4 sm:$0xff]  }
  0x9e   :  { %3307 = vmatprep.subr.bf16.mxu0 %v4768_v47  ;;  %3651 = vmatprep.subr.bf16.mxu1 %v4771_v48  ;;  %v4858_v47 = vld [vmem:[#allocation5 + $0x524] ss:$16 sps:$4 sm:$0xff]   ;;  %v4861_v48 = vld [vmem:[#allocation5 + $0x52c] ss:$16 sps:$4 sm:$0xff]  }
  0xa1   :  { %3308 = vmatpush1.bf16.msra.mxu0 %v4766_v49  ;;  %3652 = vmatpush1.bf16.msra.mxu1 %v4769_v50  ;;  %v4856_v49 = vld [vmem:[#allocation5 + $0x520] ss:$16 sps:$4 sm:$0xff]   ;;  %v4859_v50 = vld [vmem:[#allocation5 + $0x528] ss:$16 sps:$4 sm:$0xff]  }
  0xa2   :  { %3309 = vmatprep.subr.bf16.mxu0 %v4774_v51  ;;  %3653 = vmatprep.subr.bf16.mxu1 %v4777_v52  ;;  %v4864_v51 = vld [vmem:[#allocation5 + $0x544] ss:$16 sps:$4 sm:$0xff]   ;;  %v4867_v52 = vld [vmem:[#allocation5 + $0x54c] ss:$16 sps:$4 sm:$0xff]  }
  0xa5   :  { %3310 = vmatpush1.bf16.msra.mxu0 %v4772_v53  ;;  %3654 = vmatpush1.bf16.msra.mxu1 %v4775_v54  ;;  %v4862_v53 = vld [vmem:[#allocation5 + $0x540] ss:$16 sps:$4 sm:$0xff]   ;;  %v4865_v54 = vld [vmem:[#allocation5 + $0x548] ss:$16 sps:$4 sm:$0xff]  }
  0xa6   :  { %3311 = vmatprep.subr.bf16.mxu0 %v4780_v55  ;;  %3655 = vmatprep.subr.bf16.mxu1 %v4783_v56  ;;  %v4870_v55 = vld [vmem:[#allocation5 + $0x564] ss:$16 sps:$4 sm:$0xff]   ;;  %v4873_v56 = vld [vmem:[#allocation5 + $0x56c] ss:$16 sps:$4 sm:$0xff]  }
  0xa9   :  { %3312 = vmatpush1.bf16.msra.mxu0 %v4778_v57  ;;  %3656 = vmatpush1.bf16.msra.mxu1 %v4781_v58  ;;  %v4868_v57 = vld [vmem:[#allocation5 + $0x560] ss:$16 sps:$4 sm:$0xff]   ;;  %v4871_v58 = vld [vmem:[#allocation5 + $0x568] ss:$16 sps:$4 sm:$0xff]  }
  0xaa   :  { %3313 = vmatprep.subr.bf16.mxu0 %v4786_v59  ;;  %3657 = vmatprep.subr.bf16.mxu1 %v4789_v60  ;;  %v4876_v59 = vld [vmem:[#allocation5 + $0x584] ss:$16 sps:$4 sm:$0xff]   ;;  %v4879_v60 = vld [vmem:[#allocation5 + $0x58c] ss:$16 sps:$4 sm:$0xff]  }
  0xad   :  { %3314 = vmatpush1.bf16.msra.mxu0 %v4784_v61  ;;  %3658 = vmatpush1.bf16.msra.mxu1 %v4787_v62  ;;  %v4874_v61 = vld [vmem:[#allocation5 + $0x580] ss:$16 sps:$4 sm:$0xff]   ;;  %v4877_v62 = vld [vmem:[#allocation5 + $0x588] ss:$16 sps:$4 sm:$0xff]  }
  0xae   :  { %3315 = vmatprep.subr.bf16.mxu0 %v4792_v63  ;;  %3659 = vmatprep.subr.bf16.mxu1 %v4795_v0  ;;  %v4882_v63 = vld [vmem:[#allocation5 + $0x5a4] ss:$16 sps:$4 sm:$0xff]   ;;  %v4885_v0 = vld [vmem:[#allocation5 + $0x5ac] ss:$16 sps:$4 sm:$0xff]  }
  0xb1   :  { %3316 = vmatpush1.bf16.msra.mxu0 %v4790_v1  ;;  %3660 = vmatpush1.bf16.msra.mxu1 %v4793_v2  ;;  %v4880_v1 = vld [vmem:[#allocation5 + $0x5a0] ss:$16 sps:$4 sm:$0xff]   ;;  %v4883_v2 = vld [vmem:[#allocation5 + $0x5a8] ss:$16 sps:$4 sm:$0xff]  }
  0xb2   :  { %3317 = vmatprep.subr.bf16.mxu0 %v4798_v3  ;;  %3661 = vmatprep.subr.bf16.mxu1 %v4801_v4  ;;  %v4888_v3 = vld [vmem:[#allocation5 + $0x5c4] ss:$16 sps:$4 sm:$0xff]   ;;  %v4891_v4 = vld [vmem:[#allocation5 + $0x5cc] ss:$16 sps:$4 sm:$0xff]  }
  0xb5   :  { %3318 = vmatpush1.bf16.msra.mxu0 %v4796_v5  ;;  %3662 = vmatpush1.bf16.msra.mxu1 %v4799_v6  ;;  %v4886_v5 = vld [vmem:[#allocation5 + $0x5c0] ss:$16 sps:$4 sm:$0xff]   ;;  %v4889_v6 = vld [vmem:[#allocation5 + $0x5c8] ss:$16 sps:$4 sm:$0xff]  }
  0xb6   :  { %3330 = vmatprep.subr.bf16.mxu0 %v4804_v7  ;;  %3674 = vmatprep.subr.bf16.mxu1 %v4807_v8  ;;  %v4894_v7 = vld [vmem:[#allocation5 + $0x5e4] ss:$16 sps:$4 sm:$0xff]   ;;  %v4897_v8 = vld [vmem:[#allocation5 + $0x5ec] ss:$16 sps:$4 sm:$0xff]  }
  0xb8   :  { %3320 = vmatmul.mubr.bf16.vlgmr.msra.gmra.mrb[0].mxu0 %v4004_v9  ;;  %3664 = vmatmul.mubr.bf16.vlgmr.msra.gmra.mrb[0].mxu1 %v4004_v9  ;;  %v4892_v9 = vld [vmem:[#allocation5 + $0x5e0] ss:$16 sps:$4 sm:$0xff]  }
  0xb9   :  { %3331 = vmatpush1.bf16.msra.mxu0 %v4802_v10  ;;  %3675 = vmatpush1.bf16.msra.mxu1 %v4805_v11  ;;  %v4895_v10 = vld [vmem:[#allocation5 + $0x5e8] ss:$16 sps:$4 sm:$0xff]   ;;  %v4900_v11 = vld [vmem:[#allocation5 + $0x604] ss:$16 sps:$4 sm:$0xff]  }
  0xba   :  { %3332 = vmatprep.subr.bf16.mxu0 %v4810_v12  ;;  %3676 = vmatprep.subr.bf16.mxu1 %v4813_v13  ;;  %v4903_v12 = vld [vmem:[#allocation5 + $0x60c] ss:$16 sps:$4 sm:$0xff]   ;;  %v4898_v13 = vld [vmem:[#allocation5 + $0x600] ss:$16 sps:$4 sm:$0xff]  }
  0xbb   :  { %3362 = vmatprep.mubr.bf16.mxu0 %v4007_v16  ;;  %3706 = vmatprep.mubr.bf16.mxu1 %v4007_v16  ;;  %v4901_v16 = vld [vmem:[#allocation5 + $0x608] ss:$16 sps:$4 sm:$0xff]  }
  0xbd   :  { %3333 = vmatpush1.bf16.msra.mxu0 %v4808_v17  ;;  %3677 = vmatpush1.bf16.msra.mxu1 %v4811_v18  ;;  %v4006_v17 = vcombine.low %v5547_v14, %v5549_v15  ;;  %v5555_v18 = vld [vmem:[#allocation2 + $0x18] sm:$0xff]  ;;  %v4912_v14 = vld [vmem:[#allocation5 + $0x644] ss:$16 sps:$4 sm:$0xff]  }
  0xbe   :  { %3334 = vmatprep.subr.bf16.mxu0 %v4816_v19  ;;  %3678 = vmatprep.subr.bf16.mxu1 %v4819_v20  ;;  %v5557_v19 = vld [vmem:[#allocation2 + $0x58] sm:$0xff]  ;;  %v4906_v20 = vld [vmem:[#allocation5 + $0x624] ss:$16 sps:$4 sm:$0xff]  }
  0xbf   :  { %v4915_v15 = vld [vmem:[#allocation5 + $0x64c] ss:$16 sps:$4 sm:$0xff]  }
  0xc1   :  { %3335 = vmatpush1.bf16.msra.mxu0 %v4814_v21  ;;  %3679 = vmatpush1.bf16.msra.mxu1 %v4817_v22  ;;  %v4909_v21 = vld [vmem:[#allocation5 + $0x62c] ss:$16 sps:$4 sm:$0xff]   ;;  %v4009_v22 = vcombine.high %v5555_v18, %v5557_v19 }
  0xc2   :  { %3336 = vmatprep.subr.bf16.mxu0 %v4822_v23  ;;  %3680 = vmatprep.subr.bf16.mxu1 %v4825_v24  ;;  %v4904_v23 = vld [vmem:[#allocation5 + $0x620] ss:$16 sps:$4 sm:$0xff]   ;;  %v4907_v24 = vld [vmem:[#allocation5 + $0x628] ss:$16 sps:$4 sm:$0xff]  }
  0xc5   :  { %3337 = vmatpush1.bf16.msra.mxu0 %v4820_v25  ;;  %3681 = vmatpush1.bf16.msra.mxu1 %v4823_v26  ;;  %v4910_v25 = vld [vmem:[#allocation5 + $0x640] ss:$16 sps:$4 sm:$0xff]   ;;  %v4913_v26 = vld [vmem:[#allocation5 + $0x648] ss:$16 sps:$4 sm:$0xff]  }
  0xc6   :  { %3338 = vmatprep.subr.bf16.mxu0 %v4828_v27  ;;  %3682 = vmatprep.subr.bf16.mxu1 %v4831_v28  ;;  %v4918_v27 = vld [vmem:[#allocation5 + $0x664] ss:$16 sps:$4 sm:$0xff]   ;;  %v4921_v28 = vld [vmem:[#allocation5 + $0x66c] ss:$16 sps:$4 sm:$0xff]  }
  0xc9   :  { %3339 = vmatpush1.bf16.msra.mxu0 %v4826_v29  ;;  %3683 = vmatpush1.bf16.msra.mxu1 %v4829_v30  ;;  %v4916_v29 = vld [vmem:[#allocation5 + $0x660] ss:$16 sps:$4 sm:$0xff]   ;;  %v4919_v30 = vld [vmem:[#allocation5 + $0x668] ss:$16 sps:$4 sm:$0xff]  }
  0xca   :  { %3340 = vmatprep.subr.bf16.mxu0 %v4834_v31  ;;  %3684 = vmatprep.subr.bf16.mxu1 %v4837_v32  ;;  %v4924_v31 = vld [vmem:[#allocation5 + $0x684] ss:$16 sps:$4 sm:$0xff]   ;;  %v4927_v32 = vld [vmem:[#allocation5 + $0x68c] ss:$16 sps:$4 sm:$0xff]  }
  0xcd   :  { %3341 = vmatpush1.bf16.msra.mxu0 %v4832_v33  ;;  %3685 = vmatpush1.bf16.msra.mxu1 %v4835_v34  ;;  %v4922_v33 = vld [vmem:[#allocation5 + $0x680] ss:$16 sps:$4 sm:$0xff]   ;;  %v4925_v34 = vld [vmem:[#allocation5 + $0x688] ss:$16 sps:$4 sm:$0xff]  }
  0xce   :  { %3342 = vmatprep.subr.bf16.mxu0 %v4840_v35  ;;  %3686 = vmatprep.subr.bf16.mxu1 %v4843_v36  ;;  %v4930_v35 = vld [vmem:[#allocation5 + $0x6a4] ss:$16 sps:$4 sm:$0xff]   ;;  %v4933_v36 = vld [vmem:[#allocation5 + $0x6ac] ss:$16 sps:$4 sm:$0xff]  }
  0xd1   :  { %3343 = vmatpush1.bf16.msra.mxu0 %v4838_v37  ;;  %3687 = vmatpush1.bf16.msra.mxu1 %v4841_v38  ;;  %v4928_v37 = vld [vmem:[#allocation5 + $0x6a0] ss:$16 sps:$4 sm:$0xff]   ;;  %v4931_v38 = vld [vmem:[#allocation5 + $0x6a8] ss:$16 sps:$4 sm:$0xff]  }
  0xd2   :  { %3344 = vmatprep.subr.bf16.mxu0 %v4846_v39  ;;  %3688 = vmatprep.subr.bf16.mxu1 %v4849_v40  ;;  %v4936_v39 = vld [vmem:[#allocation5 + $0x6c4] ss:$16 sps:$4 sm:$0xff]   ;;  %v4939_v40 = vld [vmem:[#allocation5 + $0x6cc] ss:$16 sps:$4 sm:$0xff]  }
  0xd5   :  { %3345 = vmatpush1.bf16.msra.mxu0 %v4844_v41  ;;  %3689 = vmatpush1.bf16.msra.mxu1 %v4847_v42  ;;  %v4934_v41 = vld [vmem:[#allocation5 + $0x6c0] ss:$16 sps:$4 sm:$0xff]   ;;  %v4937_v42 = vld [vmem:[#allocation5 + $0x6c8] ss:$16 sps:$4 sm:$0xff]  }
  0xd6   :  { %3346 = vmatprep.subr.bf16.mxu0 %v4852_v43  ;;  %3690 = vmatprep.subr.bf16.mxu1 %v4855_v44  ;;  %v4942_v43 = vld [vmem:[#allocation5 + $0x6e4] ss:$16 sps:$4 sm:$0xff]   ;;  %v4945_v44 = vld [vmem:[#allocation5 + $0x6ec] ss:$16 sps:$4 sm:$0xff]  }
  0xd9   :  { %3347 = vmatpush1.bf16.msra.mxu0 %v4850_v45  ;;  %3691 = vmatpush1.bf16.msra.mxu1 %v4853_v46  ;;  %v4940_v45 = vld [vmem:[#allocation5 + $0x6e0] ss:$16 sps:$4 sm:$0xff]   ;;  %v4943_v46 = vld [vmem:[#allocation5 + $0x6e8] ss:$16 sps:$4 sm:$0xff]  }
  0xda   :  { %3348 = vmatprep.subr.bf16.mxu0 %v4858_v47  ;;  %3692 = vmatprep.subr.bf16.mxu1 %v4861_v48  ;;  %v4948_v47 = vld [vmem:[#allocation5 + $0x704] ss:$16 sps:$4 sm:$0xff]   ;;  %v4951_v48 = vld [vmem:[#allocation5 + $0x70c] ss:$16 sps:$4 sm:$0xff]  }
  0xdd   :  { %3349 = vmatpush1.bf16.msra.mxu0 %v4856_v49  ;;  %3693 = vmatpush1.bf16.msra.mxu1 %v4859_v50  ;;  %v4946_v49 = vld [vmem:[#allocation5 + $0x700] ss:$16 sps:$4 sm:$0xff]   ;;  %v4949_v50 = vld [vmem:[#allocation5 + $0x708] ss:$16 sps:$4 sm:$0xff]  }
  0xde   :  { %3350 = vmatprep.subr.bf16.mxu0 %v4864_v51  ;;  %3694 = vmatprep.subr.bf16.mxu1 %v4867_v52  ;;  %v4954_v51 = vld [vmem:[#allocation5 + $0x724] ss:$16 sps:$4 sm:$0xff]   ;;  %v4957_v52 = vld [vmem:[#allocation5 + $0x72c] ss:$16 sps:$4 sm:$0xff]  }
  0xe1   :  { %3351 = vmatpush1.bf16.msra.mxu0 %v4862_v53  ;;  %3695 = vmatpush1.bf16.msra.mxu1 %v4865_v54  ;;  %v4952_v53 = vld [vmem:[#allocation5 + $0x720] ss:$16 sps:$4 sm:$0xff]   ;;  %v4955_v54 = vld [vmem:[#allocation5 + $0x728] ss:$16 sps:$4 sm:$0xff]  }
  0xe2   :  { %3352 = vmatprep.subr.bf16.mxu0 %v4870_v55  ;;  %3696 = vmatprep.subr.bf16.mxu1 %v4873_v56  ;;  %v4960_v55 = vld [vmem:[#allocation5 + $0x744] ss:$16 sps:$4 sm:$0xff]   ;;  %v4963_v56 = vld [vmem:[#allocation5 + $0x74c] ss:$16 sps:$4 sm:$0xff]  }
  0xe5   :  { %3353 = vmatpush1.bf16.msra.mxu0 %v4868_v57  ;;  %3697 = vmatpush1.bf16.msra.mxu1 %v4871_v58  ;;  %v4958_v57 = vld [vmem:[#allocation5 + $0x740] ss:$16 sps:$4 sm:$0xff]   ;;  %v4961_v58 = vld [vmem:[#allocation5 + $0x748] ss:$16 sps:$4 sm:$0xff]  }
  0xe6   :  { %3354 = vmatprep.subr.bf16.mxu0 %v4876_v59  ;;  %3698 = vmatprep.subr.bf16.mxu1 %v4879_v60  ;;  %v4966_v59 = vld [vmem:[#allocation5 + $0x764] ss:$16 sps:$4 sm:$0xff]   ;;  %v4969_v60 = vld [vmem:[#allocation5 + $0x76c] ss:$16 sps:$4 sm:$0xff]  }
  0xe9   :  { %3355 = vmatpush1.bf16.msra.mxu0 %v4874_v61  ;;  %3699 = vmatpush1.bf16.msra.mxu1 %v4877_v62  ;;  %v4964_v61 = vld [vmem:[#allocation5 + $0x760] ss:$16 sps:$4 sm:$0xff]   ;;  %v4967_v62 = vld [vmem:[#allocation5 + $0x768] ss:$16 sps:$4 sm:$0xff]  }
  0xea   :  { %3356 = vmatprep.subr.bf16.mxu0 %v4882_v63  ;;  %3700 = vmatprep.subr.bf16.mxu1 %v4885_v0  ;;  %v4972_v63 = vld [vmem:[#allocation5 + $0x784] ss:$16 sps:$4 sm:$0xff]   ;;  %v4975_v0 = vld [vmem:[#allocation5 + $0x78c] ss:$16 sps:$4 sm:$0xff]  }
  0xed   :  { %3357 = vmatpush1.bf16.msra.mxu0 %v4880_v1  ;;  %3701 = vmatpush1.bf16.msra.mxu1 %v4883_v2  ;;  %v4970_v1 = vld [vmem:[#allocation5 + $0x780] ss:$16 sps:$4 sm:$0xff]   ;;  %v4973_v2 = vld [vmem:[#allocation5 + $0x788] ss:$16 sps:$4 sm:$0xff]  }
  0xee   :  { %3358 = vmatprep.subr.bf16.mxu0 %v4888_v3  ;;  %3702 = vmatprep.subr.bf16.mxu1 %v4891_v4  ;;  %v4978_v3 = vld [vmem:[#allocation5 + $0x7a4] ss:$16 sps:$4 sm:$0xff]   ;;  %v4981_v4 = vld [vmem:[#allocation5 + $0x7ac] ss:$16 sps:$4 sm:$0xff]  }
  0xf1   :  { %3359 = vmatpush1.bf16.msra.mxu0 %v4886_v5  ;;  %3703 = vmatpush1.bf16.msra.mxu1 %v4889_v6  ;;  %v4976_v5 = vld [vmem:[#allocation5 + $0x7a0] ss:$16 sps:$4 sm:$0xff]   ;;  %v4979_v6 = vld [vmem:[#allocation5 + $0x7a8] ss:$16 sps:$4 sm:$0xff]  }
  0xf2   :  { %3360 = vmatprep.subr.bf16.mxu0 %v4894_v7  ;;  %3704 = vmatprep.subr.bf16.mxu1 %v4897_v8  ;;  %v4984_v7 = vld [vmem:[#allocation5 + $0x7c4] ss:$16 sps:$4 sm:$0xff]   ;;  %v4987_v8 = vld [vmem:[#allocation5 + $0x7cc] ss:$16 sps:$4 sm:$0xff]  }
  0xf5   :  { %3361 = vmatpush1.bf16.msra.mxu0 %v4892_v9  ;;  %3705 = vmatpush1.bf16.msra.mxu1 %v4895_v10  ;;  %v4982_v9 = vld [vmem:[#allocation5 + $0x7c0] ss:$16 sps:$4 sm:$0xff]   ;;  %v4985_v10 = vld [vmem:[#allocation5 + $0x7c8] ss:$16 sps:$4 sm:$0xff]  }
  0xf6   :  { %3373 = vmatprep.subr.bf16.mxu0 %v4900_v11  ;;  %3717 = vmatprep.subr.bf16.mxu1 %v4903_v12  ;;  %v4990_v11 = vld [vmem:[#allocation5 + $0x7e4] ss:$16 sps:$4 sm:$0xff]   ;;  %v4993_v12 = vld [vmem:[#allocation5 + $0x7ec] ss:$16 sps:$4 sm:$0xff]  }
  0xf8   :  { %3363 = vmatmul.mubr.bf16.vlgmr.msra.gmra.mrb[0].mxu0 %v4006_v17  ;;  %3707 = vmatmul.mubr.bf16.vlgmr.msra.gmra.mrb[0].mxu1 %v4006_v17  ;;  %v4996_v17 = vld [vmem:[#allocation5 + $0x804] ss:$16 sps:$4 sm:$0xff]  }
  0xf9   :  { %3374 = vmatpush1.bf16.msra.mxu0 %v4898_v13  ;;  %3718 = vmatpush1.bf16.msra.mxu1 %v4901_v16  ;;  %v4988_v13 = vld [vmem:[#allocation5 + $0x7e0] ss:$16 sps:$4 sm:$0xff]   ;;  %v4991_v16 = vld [vmem:[#allocation5 + $0x7e8] ss:$16 sps:$4 sm:$0xff]  }
  0xfa   :  { %3375 = vmatprep.subr.bf16.mxu0 %v4906_v20  ;;  %3719 = vmatprep.subr.bf16.mxu1 %v4909_v21  ;;  %v4999_v20 = vld [vmem:[#allocation5 + $0x80c] ss:$16 sps:$4 sm:$0xff]   ;;  %v5561_v21 = vld [vmem:[#allocation2 + $0x20] sm:$0xff] }
  0xfb   :  { %3405 = vmatprep.mubr.bf16.mxu0 %v4009_v22  ;;  %3749 = vmatprep.mubr.bf16.mxu1 %v4009_v22  ;;  %v4008_v22 = vcombine.low %v5555_v18, %v5557_v19  ;;  %v5008_v18 = vld [vmem:[#allocation5 + $0x844] ss:$16 sps:$4 sm:$0xff]   ;;  %v5011_v19 = vld [vmem:[#allocation5 + $0x84c] ss:$16 sps:$4 sm:$0xff]  }
  0xfd   :  { %3376 = vmatpush1.bf16.msra.mxu0 %v4904_v23  ;;  %3720 = vmatpush1.bf16.msra.mxu1 %v4907_v24  ;;  %v5565_v23 = vld [vmem:[#allocation2 + $0x60] sm:$0xff] }
  0xfe   :  { %3377 = vmatprep.subr.bf16.mxu0 %v4912_v14  ;;  %3721 = vmatprep.subr.bf16.mxu1 %v4915_v15  ;;  %v4994_v24 = vld [vmem:[#allocation5 + $0x800] ss:$16 sps:$4 sm:$0xff]   ;;  %v4997_v14 = vld [vmem:[#allocation5 + $0x808] ss:$16 sps:$4 sm:$0xff]   ;;  %v5002_v15 = vld [vmem:[#allocation5 + $0x824] ss:$16 sps:$4 sm:$0xff]  }
 0x101   :  { %3378 = vmatpush1.bf16.msra.mxu0 %v4910_v25  ;;  %3722 = vmatpush1.bf16.msra.mxu1 %v4913_v26  ;;  %v5005_v25 = vld [vmem:[#allocation5 + $0x82c] ss:$16 sps:$4 sm:$0xff]   ;;  %v4011_v26 = vcombine.high %v5561_v21, %v5565_v23 }
 0x102   :  { %3379 = vmatprep.subr.bf16.mxu0 %v4918_v27  ;;  %3723 = vmatprep.subr.bf16.mxu1 %v4921_v28  ;;  %v5000_v27 = vld [vmem:[#allocation5 + $0x820] ss:$16 sps:$4 sm:$0xff]   ;;  %v5003_v28 = vld [vmem:[#allocation5 + $0x828] ss:$16 sps:$4 sm:$0xff]  }
 0x105   :  { %3380 = vmatpush1.bf16.msra.mxu0 %v4916_v29  ;;  %3724 = vmatpush1.bf16.msra.mxu1 %v4919_v30  ;;  %v5006_v29 = vld [vmem:[#allocation5 + $0x840] ss:$16 sps:$4 sm:$0xff]   ;;  %v5009_v30 = vld [vmem:[#allocation5 + $0x848] ss:$16 sps:$4 sm:$0xff]  }
 0x106   :  { %3381 = vmatprep.subr.bf16.mxu0 %v4924_v31  ;;  %3725 = vmatprep.subr.bf16.mxu1 %v4927_v32  ;;  %v5014_v31 = vld [vmem:[#allocation5 + $0x864] ss:$16 sps:$4 sm:$0xff]   ;;  %v5017_v32 = vld [vmem:[#allocation5 + $0x86c] ss:$16 sps:$4 sm:$0xff]  }
 0x109   :  { %3382 = vmatpush1.bf16.msra.mxu0 %v4922_v33  ;;  %3726 = vmatpush1.bf16.msra.mxu1 %v4925_v34  ;;  %v5012_v33 = vld [vmem:[#allocation5 + $0x860] ss:$16 sps:$4 sm:$0xff]   ;;  %v5015_v34 = vld [vmem:[#allocation5 + $0x868] ss:$16 sps:$4 sm:$0xff]  }
 0x10a   :  { %3383 = vmatprep.subr.bf16.mxu0 %v4930_v35  ;;  %3727 = vmatprep.subr.bf16.mxu1 %v4933_v36  ;;  %v5020_v35 = vld [vmem:[#allocation5 + $0x884] ss:$16 sps:$4 sm:$0xff]   ;;  %v5023_v36 = vld [vmem:[#allocation5 + $0x88c] ss:$16 sps:$4 sm:$0xff]  }
 0x10d   :  { %3384 = vmatpush1.bf16.msra.mxu0 %v4928_v37  ;;  %3728 = vmatpush1.bf16.msra.mxu1 %v4931_v38  ;;  %v5018_v37 = vld [vmem:[#allocation5 + $0x880] ss:$16 sps:$4 sm:$0xff]   ;;  %v5021_v38 = vld [vmem:[#allocation5 + $0x888] ss:$16 sps:$4 sm:$0xff]  }
 0x10e   :  { %3385 = vmatprep.subr.bf16.mxu0 %v4936_v39  ;;  %3729 = vmatprep.subr.bf16.mxu1 %v4939_v40  ;;  %v5026_v39 = vld [vmem:[#allocation5 + $0x8a4] ss:$16 sps:$4 sm:$0xff]   ;;  %v5029_v40 = vld [vmem:[#allocation5 + $0x8ac] ss:$16 sps:$4 sm:$0xff]  }
 0x111   :  { %3386 = vmatpush1.bf16.msra.mxu0 %v4934_v41  ;;  %3730 = vmatpush1.bf16.msra.mxu1 %v4937_v42  ;;  %v5024_v41 = vld [vmem:[#allocation5 + $0x8a0] ss:$16 sps:$4 sm:$0xff]   ;;  %v5027_v42 = vld [vmem:[#allocation5 + $0x8a8] ss:$16 sps:$4 sm:$0xff]  }
 0x112   :  { %3387 = vmatprep.subr.bf16.mxu0 %v4942_v43  ;;  %3731 = vmatprep.subr.bf16.mxu1 %v4945_v44  ;;  %v5032_v43 = vld [vmem:[#allocation5 + $0x8c4] ss:$16 sps:$4 sm:$0xff]   ;;  %v5035_v44 = vld [vmem:[#allocation5 + $0x8cc] ss:$16 sps:$4 sm:$0xff]  }
 0x115   :  { %3388 = vmatpush1.bf16.msra.mxu0 %v4940_v45  ;;  %3732 = vmatpush1.bf16.msra.mxu1 %v4943_v46  ;;  %v5030_v45 = vld [vmem:[#allocation5 + $0x8c0] ss:$16 sps:$4 sm:$0xff]   ;;  %v5033_v46 = vld [vmem:[#allocation5 + $0x8c8] ss:$16 sps:$4 sm:$0xff]  }
 0x116   :  { %3389 = vmatprep.subr.bf16.mxu0 %v4948_v47  ;;  %3733 = vmatprep.subr.bf16.mxu1 %v4951_v48  ;;  %v5038_v47 = vld [vmem:[#allocation5 + $0x8e4] ss:$16 sps:$4 sm:$0xff]   ;;  %v5041_v48 = vld [vmem:[#allocation5 + $0x8ec] ss:$16 sps:$4 sm:$0xff]  }
 0x119   :  { %3390 = vmatpush1.bf16.msra.mxu0 %v4946_v49  ;;  %3734 = vmatpush1.bf16.msra.mxu1 %v4949_v50  ;;  %v5036_v49 = vld [vmem:[#allocation5 + $0x8e0] ss:$16 sps:$4 sm:$0xff]   ;;  %v5039_v50 = vld [vmem:[#allocation5 + $0x8e8] ss:$16 sps:$4 sm:$0xff]  }
 0x11a   :  { %3391 = vmatprep.subr.bf16.mxu0 %v4954_v51  ;;  %3735 = vmatprep.subr.bf16.mxu1 %v4957_v52  ;;  %v5044_v51 = vld [vmem:[#allocation5 + $0x904] ss:$16 sps:$4 sm:$0xff]   ;;  %v5047_v52 = vld [vmem:[#allocation5 + $0x90c] ss:$16 sps:$4 sm:$0xff]  }
 0x11d   :  { %3392 = vmatpush1.bf16.msra.mxu0 %v4952_v53  ;;  %3736 = vmatpush1.bf16.msra.mxu1 %v4955_v54  ;;  %v5042_v53 = vld [vmem:[#allocation5 + $0x900] ss:$16 sps:$4 sm:$0xff]   ;;  %v5045_v54 = vld [vmem:[#allocation5 + $0x908] ss:$16 sps:$4 sm:$0xff]  }
 0x11e   :  { %3393 = vmatprep.subr.bf16.mxu0 %v4960_v55  ;;  %3737 = vmatprep.subr.bf16.mxu1 %v4963_v56  ;;  %v5050_v55 = vld [vmem:[#allocation5 + $0x924] ss:$16 sps:$4 sm:$0xff]   ;;  %v5053_v56 = vld [vmem:[#allocation5 + $0x92c] ss:$16 sps:$4 sm:$0xff]  }
 0x121   :  { %3394 = vmatpush1.bf16.msra.mxu0 %v4958_v57  ;;  %3738 = vmatpush1.bf16.msra.mxu1 %v4961_v58  ;;  %v5048_v57 = vld [vmem:[#allocation5 + $0x920] ss:$16 sps:$4 sm:$0xff]   ;;  %v5051_v58 = vld [vmem:[#allocation5 + $0x928] ss:$16 sps:$4 sm:$0xff]  }
 0x122   :  { %3395 = vmatprep.subr.bf16.mxu0 %v4966_v59  ;;  %3739 = vmatprep.subr.bf16.mxu1 %v4969_v60  ;;  %v5056_v59 = vld [vmem:[#allocation5 + $0x944] ss:$16 sps:$4 sm:$0xff]   ;;  %v5059_v60 = vld [vmem:[#allocation5 + $0x94c] ss:$16 sps:$4 sm:$0xff]  }
 0x125   :  { %3396 = vmatpush1.bf16.msra.mxu0 %v4964_v61  ;;  %3740 = vmatpush1.bf16.msra.mxu1 %v4967_v62  ;;  %v5054_v61 = vld [vmem:[#allocation5 + $0x940] ss:$16 sps:$4 sm:$0xff]   ;;  %v5057_v62 = vld [vmem:[#allocation5 + $0x948] ss:$16 sps:$4 sm:$0xff]  }
 0x126   :  { %3397 = vmatprep.subr.bf16.mxu0 %v4972_v63  ;;  %3741 = vmatprep.subr.bf16.mxu1 %v4975_v0  ;;  %v5062_v63 = vld [vmem:[#allocation5 + $0x964] ss:$16 sps:$4 sm:$0xff]   ;;  %v5065_v0 = vld [vmem:[#allocation5 + $0x96c] ss:$16 sps:$4 sm:$0xff]  }
 0x129   :  { %3398 = vmatpush1.bf16.msra.mxu0 %v4970_v1  ;;  %3742 = vmatpush1.bf16.msra.mxu1 %v4973_v2  ;;  %v5060_v1 = vld [vmem:[#allocation5 + $0x960] ss:$16 sps:$4 sm:$0xff]   ;;  %v5063_v2 = vld [vmem:[#allocation5 + $0x968] ss:$16 sps:$4 sm:$0xff]  }
 0x12a   :  { %3399 = vmatprep.subr.bf16.mxu0 %v4978_v3  ;;  %3743 = vmatprep.subr.bf16.mxu1 %v4981_v4  ;;  %v5068_v3 = vld [vmem:[#allocation5 + $0x984] ss:$16 sps:$4 sm:$0xff]   ;;  %v5071_v4 = vld [vmem:[#allocation5 + $0x98c] ss:$16 sps:$4 sm:$0xff]  }
 0x12d   :  { %3400 = vmatpush1.bf16.msra.mxu0 %v4976_v5  ;;  %3744 = vmatpush1.bf16.msra.mxu1 %v4979_v6  ;;  %v5066_v5 = vld [vmem:[#allocation5 + $0x980] ss:$16 sps:$4 sm:$0xff]   ;;  %v5069_v6 = vld [vmem:[#allocation5 + $0x988] ss:$16 sps:$4 sm:$0xff]  }
 0x12e   :  { %3401 = vmatprep.subr.bf16.mxu0 %v4984_v7  ;;  %3745 = vmatprep.subr.bf16.mxu1 %v4987_v8  ;;  %v5074_v7 = vld [vmem:[#allocation5 + $0x9a4] ss:$16 sps:$4 sm:$0xff]   ;;  %v5077_v8 = vld [vmem:[#allocation5 + $0x9ac] ss:$16 sps:$4 sm:$0xff]  }
 0x131   :  { %3402 = vmatpush1.bf16.msra.mxu0 %v4982_v9  ;;  %3746 = vmatpush1.bf16.msra.mxu1 %v4985_v10  ;;  %v5072_v9 = vld [vmem:[#allocation5 + $0x9a0] ss:$16 sps:$4 sm:$0xff]   ;;  %v5075_v10 = vld [vmem:[#allocation5 + $0x9a8] ss:$16 sps:$4 sm:$0xff]  }
 0x132   :  { %3403 = vmatprep.subr.bf16.mxu0 %v4990_v11  ;;  %3747 = vmatprep.subr.bf16.mxu1 %v4993_v12  ;;  %v5080_v11 = vld [vmem:[#allocation5 + $0x9c4] ss:$16 sps:$4 sm:$0xff]   ;;  %v5083_v12 = vld [vmem:[#allocation5 + $0x9cc] ss:$16 sps:$4 sm:$0xff]  }
 0x135   :  { %3404 = vmatpush1.bf16.msra.mxu0 %v4988_v13  ;;  %3748 = vmatpush1.bf16.msra.mxu1 %v4991_v16  ;;  %v5078_v13 = vld [vmem:[#allocation5 + $0x9c0] ss:$16 sps:$4 sm:$0xff]   ;;  %v5081_v16 = vld [vmem:[#allocation5 + $0x9c8] ss:$16 sps:$4 sm:$0xff]  }
 0x136   :  { %3416 = vmatprep.subr.bf16.mxu0 %v4996_v17  ;;  %3760 = vmatprep.subr.bf16.mxu1 %v4999_v20  ;;  %v5086_v17 = vld [vmem:[#allocation5 + $0x9e4] ss:$16 sps:$4 sm:$0xff]   ;;  %v5089_v20 = vld [vmem:[#allocation5 + $0x9ec] ss:$16 sps:$4 sm:$0xff]  }
 0x138   :  { %3406 = vmatmul.mubr.bf16.vlgmr.msra.gmra.mrb[0].mxu0 %v4008_v22  ;;  %3750 = vmatmul.mubr.bf16.vlgmr.msra.gmra.mrb[0].mxu1 %v4008_v22  ;;  %v5084_v22 = vld [vmem:[#allocation5 + $0x9e0] ss:$16 sps:$4 sm:$0xff]  }
 0x139   :  { %3417 = vmatpush1.bf16.msra.mxu0 %v4994_v24  ;;  %3761 = vmatpush1.bf16.msra.mxu1 %v4997_v14  ;;  %v5087_v24 = vld [vmem:[#allocation5 + $0x9e8] ss:$16 sps:$4 sm:$0xff]   ;;  %v5092_v14 = vld [vmem:[#allocation5 + $0xa04] ss:$16 sps:$4 sm:$0xff]  }
 0x13a   :  { %3418 = vmatprep.subr.bf16.mxu0 %v5002_v15  ;;  %3762 = vmatprep.subr.bf16.mxu1 %v5005_v25  ;;  %v5095_v15 = vld [vmem:[#allocation5 + $0xa0c] ss:$16 sps:$4 sm:$0xff]  }
 0x13b   :  { %3448 = vmatprep.mubr.bf16.mxu0 %v4011_v26  ;;  %3792 = vmatprep.mubr.bf16.mxu1 %v4011_v26  ;;  %v5569_v25 = vld [vmem:[#allocation2 + $0x28] sm:$0xff] }
 0x13c   :  { %v5571_v26 = vld [vmem:[#allocation2 + $0x68] sm:$0xff] }
 0x13d   :  { %3419 = vmatpush1.bf16.msra.mxu0 %v5000_v27  ;;  %3763 = vmatpush1.bf16.msra.mxu1 %v5003_v28  ;;  %v4010_v27 = vcombine.low %v5561_v21, %v5565_v23  ;;  %v5090_v28 = vld [vmem:[#allocation5 + $0xa00] ss:$16 sps:$4 sm:$0xff]   ;;  %v5104_v21 = vld [vmem:[#allocation5 + $0xa44] ss:$16 sps:$4 sm:$0xff]   ;;  %v5107_v23 = vld [vmem:[#allocation5 + $0xa4c] ss:$16 sps:$4 sm:$0xff]  }
 0x13e   :  { %3420 = vmatprep.subr.bf16.mxu0 %v5008_v18  ;;  %3764 = vmatprep.subr.bf16.mxu1 %v5011_v19  ;;  %v5093_v18 = vld [vmem:[#allocation5 + $0xa08] ss:$16 sps:$4 sm:$0xff]   ;;  %v5098_v19 = vld [vmem:[#allocation5 + $0xa24] ss:$16 sps:$4 sm:$0xff]  }
 0x141   :  { %3421 = vmatpush1.bf16.msra.mxu0 %v5006_v29  ;;  %3765 = vmatpush1.bf16.msra.mxu1 %v5009_v30  ;;  %v5101_v29 = vld [vmem:[#allocation5 + $0xa2c] ss:$16 sps:$4 sm:$0xff]   ;;  %v4013_v30 = vcombine.high %v5569_v25, %v5571_v26 }
 0x142   :  { %3422 = vmatprep.subr.bf16.mxu0 %v5014_v31  ;;  %3766 = vmatprep.subr.bf16.mxu1 %v5017_v32  ;;  %v5096_v31 = vld [vmem:[#allocation5 + $0xa20] ss:$16 sps:$4 sm:$0xff]   ;;  %v5099_v32 = vld [vmem:[#allocation5 + $0xa28] ss:$16 sps:$4 sm:$0xff]  }
 0x145   :  { %3423 = vmatpush1.bf16.msra.mxu0 %v5012_v33  ;;  %3767 = vmatpush1.bf16.msra.mxu1 %v5015_v34  ;;  %v5102_v33 = vld [vmem:[#allocation5 + $0xa40] ss:$16 sps:$4 sm:$0xff]   ;;  %v5105_v34 = vld [vmem:[#allocation5 + $0xa48] ss:$16 sps:$4 sm:$0xff]  }
 0x146   :  { %3424 = vmatprep.subr.bf16.mxu0 %v5020_v35  ;;  %3768 = vmatprep.subr.bf16.mxu1 %v5023_v36  ;;  %v5110_v35 = vld [vmem:[#allocation5 + $0xa64] ss:$16 sps:$4 sm:$0xff]   ;;  %v5113_v36 = vld [vmem:[#allocation5 + $0xa6c] ss:$16 sps:$4 sm:$0xff]  }
 0x149   :  { %3425 = vmatpush1.bf16.msra.mxu0 %v5018_v37  ;;  %3769 = vmatpush1.bf16.msra.mxu1 %v5021_v38  ;;  %v5108_v37 = vld [vmem:[#allocation5 + $0xa60] ss:$16 sps:$4 sm:$0xff]   ;;  %v5111_v38 = vld [vmem:[#allocation5 + $0xa68] ss:$16 sps:$4 sm:$0xff]  }
 0x14a   :  { %3426 = vmatprep.subr.bf16.mxu0 %v5026_v39  ;;  %3770 = vmatprep.subr.bf16.mxu1 %v5029_v40  ;;  %v5116_v39 = vld [vmem:[#allocation5 + $0xa84] ss:$16 sps:$4 sm:$0xff]   ;;  %v5119_v40 = vld [vmem:[#allocation5 + $0xa8c] ss:$16 sps:$4 sm:$0xff]  }
 0x14d   :  { %3427 = vmatpush1.bf16.msra.mxu0 %v5024_v41  ;;  %3771 = vmatpush1.bf16.msra.mxu1 %v5027_v42  ;;  %v5114_v41 = vld [vmem:[#allocation5 + $0xa80] ss:$16 sps:$4 sm:$0xff]   ;;  %v5117_v42 = vld [vmem:[#allocation5 + $0xa88] ss:$16 sps:$4 sm:$0xff]  }
 0x14e   :  { %3428 = vmatprep.subr.bf16.mxu0 %v5032_v43  ;;  %3772 = vmatprep.subr.bf16.mxu1 %v5035_v44  ;;  %v5122_v43 = vld [vmem:[#allocation5 + $0xaa4] ss:$16 sps:$4 sm:$0xff]   ;;  %v5125_v44 = vld [vmem:[#allocation5 + $0xaac] ss:$16 sps:$4 sm:$0xff]  }
 0x151   :  { %3429 = vmatpush1.bf16.msra.mxu0 %v5030_v45  ;;  %3773 = vmatpush1.bf16.msra.mxu1 %v5033_v46  ;;  %v5120_v45 = vld [vmem:[#allocation5 + $0xaa0] ss:$16 sps:$4 sm:$0xff]   ;;  %v5123_v46 = vld [vmem:[#allocation5 + $0xaa8] ss:$16 sps:$4 sm:$0xff]  }
 0x152   :  { %3430 = vmatprep.subr.bf16.mxu0 %v5038_v47  ;;  %3774 = vmatprep.subr.bf16.mxu1 %v5041_v48  ;;  %v5128_v47 = vld [vmem:[#allocation5 + $0xac4] ss:$16 sps:$4 sm:$0xff]   ;;  %v5131_v48 = vld [vmem:[#allocation5 + $0xacc] ss:$16 sps:$4 sm:$0xff]  }
 0x155   :  { %3431 = vmatpush1.bf16.msra.mxu0 %v5036_v49  ;;  %3775 = vmatpush1.bf16.msra.mxu1 %v5039_v50  ;;  %v5126_v49 = vld [vmem:[#allocation5 + $0xac0] ss:$16 sps:$4 sm:$0xff]   ;;  %v5129_v50 = vld [vmem:[#allocation5 + $0xac8] ss:$16 sps:$4 sm:$0xff]  }
 0x156   :  { %3432 = vmatprep.subr.bf16.mxu0 %v5044_v51  ;;  %3776 = vmatprep.subr.bf16.mxu1 %v5047_v52  ;;  %v5134_v51 = vld [vmem:[#allocation5 + $0xae4] ss:$16 sps:$4 sm:$0xff]   ;;  %v5137_v52 = vld [vmem:[#allocation5 + $0xaec] ss:$16 sps:$4 sm:$0xff]  }
 0x159   :  { %3433 = vmatpush1.bf16.msra.mxu0 %v5042_v53  ;;  %3777 = vmatpush1.bf16.msra.mxu1 %v5045_v54  ;;  %v5132_v53 = vld [vmem:[#allocation5 + $0xae0] ss:$16 sps:$4 sm:$0xff]   ;;  %v5135_v54 = vld [vmem:[#allocation5 + $0xae8] ss:$16 sps:$4 sm:$0xff]  }
 0x15a   :  { %3434 = vmatprep.subr.bf16.mxu0 %v5050_v55  ;;  %3778 = vmatprep.subr.bf16.mxu1 %v5053_v56  ;;  %v5140_v55 = vld [vmem:[#allocation5 + $0xb04] ss:$16 sps:$4 sm:$0xff]   ;;  %v5143_v56 = vld [vmem:[#allocation5 + $0xb0c] ss:$16 sps:$4 sm:$0xff]  }
 0x15d   :  { %3435 = vmatpush1.bf16.msra.mxu0 %v5048_v57  ;;  %3779 = vmatpush1.bf16.msra.mxu1 %v5051_v58  ;;  %v5138_v57 = vld [vmem:[#allocation5 + $0xb00] ss:$16 sps:$4 sm:$0xff]   ;;  %v5141_v58 = vld [vmem:[#allocation5 + $0xb08] ss:$16 sps:$4 sm:$0xff]  }
 0x15e   :  { %3436 = vmatprep.subr.bf16.mxu0 %v5056_v59  ;;  %3780 = vmatprep.subr.bf16.mxu1 %v5059_v60  ;;  %v5146_v59 = vld [vmem:[#allocation5 + $0xb24] ss:$16 sps:$4 sm:$0xff]   ;;  %v5149_v60 = vld [vmem:[#allocation5 + $0xb2c] ss:$16 sps:$4 sm:$0xff]  }
 0x161   :  { %3437 = vmatpush1.bf16.msra.mxu0 %v5054_v61  ;;  %3781 = vmatpush1.bf16.msra.mxu1 %v5057_v62  ;;  %v5144_v61 = vld [vmem:[#allocation5 + $0xb20] ss:$16 sps:$4 sm:$0xff]   ;;  %v5147_v62 = vld [vmem:[#allocation5 + $0xb28] ss:$16 sps:$4 sm:$0xff]  }
 0x162   :  { %3438 = vmatprep.subr.bf16.mxu0 %v5062_v63  ;;  %3782 = vmatprep.subr.bf16.mxu1 %v5065_v0  ;;  %v5152_v63 = vld [vmem:[#allocation5 + $0xb44] ss:$16 sps:$4 sm:$0xff]   ;;  %v5155_v0 = vld [vmem:[#allocation5 + $0xb4c] ss:$16 sps:$4 sm:$0xff]  }
 0x165   :  { %3439 = vmatpush1.bf16.msra.mxu0 %v5060_v1  ;;  %3783 = vmatpush1.bf16.msra.mxu1 %v5063_v2  ;;  %v5150_v1 = vld [vmem:[#allocation5 + $0xb40] ss:$16 sps:$4 sm:$0xff]   ;;  %v5153_v2 = vld [vmem:[#allocation5 + $0xb48] ss:$16 sps:$4 sm:$0xff]  }
 0x166   :  { %3440 = vmatprep.subr.bf16.mxu0 %v5068_v3  ;;  %3784 = vmatprep.subr.bf16.mxu1 %v5071_v4  ;;  %v5158_v3 = vld [vmem:[#allocation5 + $0xb64] ss:$16 sps:$4 sm:$0xff]   ;;  %v5161_v4 = vld [vmem:[#allocation5 + $0xb6c] ss:$16 sps:$4 sm:$0xff]  }
 0x169   :  { %3441 = vmatpush1.bf16.msra.mxu0 %v5066_v5  ;;  %3785 = vmatpush1.bf16.msra.mxu1 %v5069_v6  ;;  %v5156_v5 = vld [vmem:[#allocation5 + $0xb60] ss:$16 sps:$4 sm:$0xff]   ;;  %v5159_v6 = vld [vmem:[#allocation5 + $0xb68] ss:$16 sps:$4 sm:$0xff]  }
 0x16a   :  { %3442 = vmatprep.subr.bf16.mxu0 %v5074_v7  ;;  %3786 = vmatprep.subr.bf16.mxu1 %v5077_v8  ;;  %v5164_v7 = vld [vmem:[#allocation5 + $0xb84] ss:$16 sps:$4 sm:$0xff]   ;;  %v5167_v8 = vld [vmem:[#allocation5 + $0xb8c] ss:$16 sps:$4 sm:$0xff]  }
 0x16d   :  { %3443 = vmatpush1.bf16.msra.mxu0 %v5072_v9  ;;  %3787 = vmatpush1.bf16.msra.mxu1 %v5075_v10  ;;  %v5162_v9 = vld [vmem:[#allocation5 + $0xb80] ss:$16 sps:$4 sm:$0xff]   ;;  %v5165_v10 = vld [vmem:[#allocation5 + $0xb88] ss:$16 sps:$4 sm:$0xff]  }
 0x16e   :  { %3444 = vmatprep.subr.bf16.mxu0 %v5080_v11  ;;  %3788 = vmatprep.subr.bf16.mxu1 %v5083_v12  ;;  %v5170_v11 = vld [vmem:[#allocation5 + $0xba4] ss:$16 sps:$4 sm:$0xff]   ;;  %v5173_v12 = vld [vmem:[#allocation5 + $0xbac] ss:$16 sps:$4 sm:$0xff]  }
 0x171   :  { %3445 = vmatpush1.bf16.msra.mxu0 %v5078_v13  ;;  %3789 = vmatpush1.bf16.msra.mxu1 %v5081_v16  ;;  %v5168_v13 = vld [vmem:[#allocation5 + $0xba0] ss:$16 sps:$4 sm:$0xff]   ;;  %v5171_v16 = vld [vmem:[#allocation5 + $0xba8] ss:$16 sps:$4 sm:$0xff]  }
 0x172   :  { %3446 = vmatprep.subr.bf16.mxu0 %v5086_v17  ;;  %3790 = vmatprep.subr.bf16.mxu1 %v5089_v20  ;;  %v5176_v17 = vld [vmem:[#allocation5 + $0xbc4] ss:$16 sps:$4 sm:$0xff]   ;;  %v5179_v20 = vld [vmem:[#allocation5 + $0xbcc] ss:$16 sps:$4 sm:$0xff]  }
 0x175   :  { %3447 = vmatpush1.bf16.msra.mxu0 %v5084_v22  ;;  %3791 = vmatpush1.bf16.msra.mxu1 %v5087_v24  ;;  %v5174_v22 = vld [vmem:[#allocation5 + $0xbc0] ss:$16 sps:$4 sm:$0xff]   ;;  %v5177_v24 = vld [vmem:[#allocation5 + $0xbc8] ss:$16 sps:$4 sm:$0xff]  }
 0x176   :  { %3459 = vmatprep.subr.bf16.mxu0 %v5092_v14  ;;  %3803 = vmatprep.subr.bf16.mxu1 %v5095_v15  ;;  %v5182_v14 = vld [vmem:[#allocation5 + $0xbe4] ss:$16 sps:$4 sm:$0xff]   ;;  %v5185_v15 = vld [vmem:[#allocation5 + $0xbec] ss:$16 sps:$4 sm:$0xff]  }
 0x178   :  { %3449 = vmatmul.mubr.bf16.vlgmr.msra.gmra.mrb[0].mxu0 %v4010_v27  ;;  %3793 = vmatmul.mubr.bf16.vlgmr.msra.gmra.mrb[0].mxu1 %v4010_v27  ;;  %v5180_v27 = vld [vmem:[#allocation5 + $0xbe0] ss:$16 sps:$4 sm:$0xff]  }
 0x179   :  { %3460 = vmatpush1.bf16.msra.mxu0 %v5090_v28  ;;  %3804 = vmatpush1.bf16.msra.mxu1 %v5093_v18  ;;  %v5183_v28 = vld [vmem:[#allocation5 + $0xbe8] ss:$16 sps:$4 sm:$0xff]   ;;  %v5188_v18 = vld [vmem:[#allocation5 + $0xc04] ss:$16 sps:$4 sm:$0xff]  }
 0x17a   :  { %3461 = vmatprep.subr.bf16.mxu0 %v5098_v19  ;;  %3805 = vmatprep.subr.bf16.mxu1 %v5101_v29  ;;  %v5191_v19 = vld [vmem:[#allocation5 + $0xc0c] ss:$16 sps:$4 sm:$0xff]   ;;  %v4012_v29 = vcombine.low %v5569_v25, %v5571_v26  ;;  %v5192_v25 = vld [vmem:[#allocation5 + $0xc20] ss:$16 sps:$4 sm:$0xff]   ;;  %v5195_v26 = vld [vmem:[#allocation5 + $0xc28] ss:$16 sps:$4 sm:$0xff]  }
 0x17b   :  { %3491 = vmatprep.mubr.bf16.mxu0 %v4013_v30  ;;  %3835 = vmatprep.mubr.bf16.mxu1 %v4013_v30  ;;  %v5579_v30 = vld [vmem:[#allocation2 + $0x30] sm:$0xff] }
 0x17d   :  { %3462 = vmatpush1.bf16.msra.mxu0 %v5096_v31  ;;  %3806 = vmatpush1.bf16.msra.mxu1 %v5099_v32  ;;  %v5581_v31 = vld [vmem:[#allocation2 + $0x70] sm:$0xff] }
 0x17e   :  { %3463 = vmatprep.subr.bf16.mxu0 %v5104_v21  ;;  %3807 = vmatprep.subr.bf16.mxu1 %v5107_v23  ;;  %v5186_v32 = vld [vmem:[#allocation5 + $0xc00] ss:$16 sps:$4 sm:$0xff]   ;;  %v5189_v21 = vld [vmem:[#allocation5 + $0xc08] ss:$16 sps:$4 sm:$0xff]   ;;  %v5194_v23 = vld [vmem:[#allocation5 + $0xc24] ss:$16 sps:$4 sm:$0xff]  }
 0x181   :  { %3464 = vmatpush1.bf16.msra.mxu0 %v5102_v33  ;;  %3808 = vmatpush1.bf16.msra.mxu1 %v5105_v34  ;;  %v5197_v33 = vld [vmem:[#allocation5 + $0xc2c] ss:$16 sps:$4 sm:$0xff]   ;;  %v4015_v34 = vcombine.high %v5579_v30, %v5581_v31 }
 0x182   :  { %3465 = vmatprep.subr.bf16.mxu0 %v5110_v35  ;;  %3809 = vmatprep.subr.bf16.mxu1 %v5113_v36  ;;  %v5200_v35 = vld [vmem:[#allocation5 + $0xc44] ss:$16 sps:$4 sm:$0xff]   ;;  %v5203_v36 = vld [vmem:[#allocation5 + $0xc4c] ss:$16 sps:$4 sm:$0xff]  }
 0x185   :  { %3466 = vmatpush1.bf16.msra.mxu0 %v5108_v37  ;;  %3810 = vmatpush1.bf16.msra.mxu1 %v5111_v38  ;;  %v5198_v37 = vld [vmem:[#allocation5 + $0xc40] ss:$16 sps:$4 sm:$0xff]   ;;  %v5201_v38 = vld [vmem:[#allocation5 + $0xc48] ss:$16 sps:$4 sm:$0xff]  }
 0x186   :  { %3467 = vmatprep.subr.bf16.mxu0 %v5116_v39  ;;  %3811 = vmatprep.subr.bf16.mxu1 %v5119_v40  ;;  %v5206_v39 = vld [vmem:[#allocation5 + $0xc64] ss:$16 sps:$4 sm:$0xff]   ;;  %v5209_v40 = vld [vmem:[#allocation5 + $0xc6c] ss:$16 sps:$4 sm:$0xff]  }
 0x189   :  { %3468 = vmatpush1.bf16.msra.mxu0 %v5114_v41  ;;  %3812 = vmatpush1.bf16.msra.mxu1 %v5117_v42  ;;  %v5204_v41 = vld [vmem:[#allocation5 + $0xc60] ss:$16 sps:$4 sm:$0xff]   ;;  %v5207_v42 = vld [vmem:[#allocation5 + $0xc68] ss:$16 sps:$4 sm:$0xff]  }
 0x18a   :  { %3469 = vmatprep.subr.bf16.mxu0 %v5122_v43  ;;  %3813 = vmatprep.subr.bf16.mxu1 %v5125_v44  ;;  %v5212_v43 = vld [vmem:[#allocation5 + $0xc84] ss:$16 sps:$4 sm:$0xff]   ;;  %v5215_v44 = vld [vmem:[#allocation5 + $0xc8c] ss:$16 sps:$4 sm:$0xff]  }
 0x18d   :  { %3470 = vmatpush1.bf16.msra.mxu0 %v5120_v45  ;;  %3814 = vmatpush1.bf16.msra.mxu1 %v5123_v46  ;;  %v5210_v45 = vld [vmem:[#allocation5 + $0xc80] ss:$16 sps:$4 sm:$0xff]   ;;  %v5213_v46 = vld [vmem:[#allocation5 + $0xc88] ss:$16 sps:$4 sm:$0xff]  }
 0x18e   :  { %3471 = vmatprep.subr.bf16.mxu0 %v5128_v47  ;;  %3815 = vmatprep.subr.bf16.mxu1 %v5131_v48  ;;  %v5218_v47 = vld [vmem:[#allocation5 + $0xca4] ss:$16 sps:$4 sm:$0xff]   ;;  %v5221_v48 = vld [vmem:[#allocation5 + $0xcac] ss:$16 sps:$4 sm:$0xff]  }
 0x191   :  { %3472 = vmatpush1.bf16.msra.mxu0 %v5126_v49  ;;  %3816 = vmatpush1.bf16.msra.mxu1 %v5129_v50  ;;  %v5216_v49 = vld [vmem:[#allocation5 + $0xca0] ss:$16 sps:$4 sm:$0xff]   ;;  %v5219_v50 = vld [vmem:[#allocation5 + $0xca8] ss:$16 sps:$4 sm:$0xff]  }
 0x192   :  { %3473 = vmatprep.subr.bf16.mxu0 %v5134_v51  ;;  %3817 = vmatprep.subr.bf16.mxu1 %v5137_v52  ;;  %v5224_v51 = vld [vmem:[#allocation5 + $0xcc4] ss:$16 sps:$4 sm:$0xff]   ;;  %v5227_v52 = vld [vmem:[#allocation5 + $0xccc] ss:$16 sps:$4 sm:$0xff]  }
 0x195   :  { %3474 = vmatpush1.bf16.msra.mxu0 %v5132_v53  ;;  %3818 = vmatpush1.bf16.msra.mxu1 %v5135_v54  ;;  %v5222_v53 = vld [vmem:[#allocation5 + $0xcc0] ss:$16 sps:$4 sm:$0xff]   ;;  %v5225_v54 = vld [vmem:[#allocation5 + $0xcc8] ss:$16 sps:$4 sm:$0xff]  }
 0x196   :  { %3475 = vmatprep.subr.bf16.mxu0 %v5140_v55  ;;  %3819 = vmatprep.subr.bf16.mxu1 %v5143_v56  ;;  %v5230_v55 = vld [vmem:[#allocation5 + $0xce4] ss:$16 sps:$4 sm:$0xff]   ;;  %v5233_v56 = vld [vmem:[#allocation5 + $0xcec] ss:$16 sps:$4 sm:$0xff]  }
 0x199   :  { %3476 = vmatpush1.bf16.msra.mxu0 %v5138_v57  ;;  %3820 = vmatpush1.bf16.msra.mxu1 %v5141_v58  ;;  %v5228_v57 = vld [vmem:[#allocation5 + $0xce0] ss:$16 sps:$4 sm:$0xff]   ;;  %v5231_v58 = vld [vmem:[#allocation5 + $0xce8] ss:$16 sps:$4 sm:$0xff]  }
 0x19a   :  { %3477 = vmatprep.subr.bf16.mxu0 %v5146_v59  ;;  %3821 = vmatprep.subr.bf16.mxu1 %v5149_v60  ;;  %v5236_v59 = vld [vmem:[#allocation5 + $0xd04] ss:$16 sps:$4 sm:$0xff]   ;;  %v5239_v60 = vld [vmem:[#allocation5 + $0xd0c] ss:$16 sps:$4 sm:$0xff]  }
 0x19d   :  { %3478 = vmatpush1.bf16.msra.mxu0 %v5144_v61  ;;  %3822 = vmatpush1.bf16.msra.mxu1 %v5147_v62  ;;  %v5234_v61 = vld [vmem:[#allocation5 + $0xd00] ss:$16 sps:$4 sm:$0xff]   ;;  %v5237_v62 = vld [vmem:[#allocation5 + $0xd08] ss:$16 sps:$4 sm:$0xff]  }
 0x19e   :  { %3479 = vmatprep.subr.bf16.mxu0 %v5152_v63  ;;  %3823 = vmatprep.subr.bf16.mxu1 %v5155_v0  ;;  %v5242_v63 = vld [vmem:[#allocation5 + $0xd24] ss:$16 sps:$4 sm:$0xff]   ;;  %v5245_v0 = vld [vmem:[#allocation5 + $0xd2c] ss:$16 sps:$4 sm:$0xff]  }
 0x1a1   :  { %3480 = vmatpush1.bf16.msra.mxu0 %v5150_v1  ;;  %3824 = vmatpush1.bf16.msra.mxu1 %v5153_v2  ;;  %v5240_v1 = vld [vmem:[#allocation5 + $0xd20] ss:$16 sps:$4 sm:$0xff]   ;;  %v5243_v2 = vld [vmem:[#allocation5 + $0xd28] ss:$16 sps:$4 sm:$0xff]  }
 0x1a2   :  { %3481 = vmatprep.subr.bf16.mxu0 %v5158_v3  ;;  %3825 = vmatprep.subr.bf16.mxu1 %v5161_v4  ;;  %v5248_v3 = vld [vmem:[#allocation5 + $0xd44] ss:$16 sps:$4 sm:$0xff]   ;;  %v5251_v4 = vld [vmem:[#allocation5 + $0xd4c] ss:$16 sps:$4 sm:$0xff]  }
 0x1a5   :  { %3482 = vmatpush1.bf16.msra.mxu0 %v5156_v5  ;;  %3826 = vmatpush1.bf16.msra.mxu1 %v5159_v6  ;;  %v5246_v5 = vld [vmem:[#allocation5 + $0xd40] ss:$16 sps:$4 sm:$0xff]   ;;  %v5249_v6 = vld [vmem:[#allocation5 + $0xd48] ss:$16 sps:$4 sm:$0xff]  }
 0x1a6   :  { %3483 = vmatprep.subr.bf16.mxu0 %v5164_v7  ;;  %3827 = vmatprep.subr.bf16.mxu1 %v5167_v8  ;;  %v5254_v7 = vld [vmem:[#allocation5 + $0xd64] ss:$16 sps:$4 sm:$0xff]   ;;  %v5257_v8 = vld [vmem:[#allocation5 + $0xd6c] ss:$16 sps:$4 sm:$0xff]  }
 0x1a9   :  { %3484 = vmatpush1.bf16.msra.mxu0 %v5162_v9  ;;  %3828 = vmatpush1.bf16.msra.mxu1 %v5165_v10  ;;  %v5252_v9 = vld [vmem:[#allocation5 + $0xd60] ss:$16 sps:$4 sm:$0xff]   ;;  %v5255_v10 = vld [vmem:[#allocation5 + $0xd68] ss:$16 sps:$4 sm:$0xff]  }
 0x1aa   :  { %3485 = vmatprep.subr.bf16.mxu0 %v5170_v11  ;;  %3829 = vmatprep.subr.bf16.mxu1 %v5173_v12  ;;  %v5260_v11 = vld [vmem:[#allocation5 + $0xd84] ss:$16 sps:$4 sm:$0xff]   ;;  %v5263_v12 = vld [vmem:[#allocation5 + $0xd8c] ss:$16 sps:$4 sm:$0xff]  }
 0x1ad   :  { %3486 = vmatpush1.bf16.msra.mxu0 %v5168_v13  ;;  %3830 = vmatpush1.bf16.msra.mxu1 %v5171_v16  ;;  %v5258_v13 = vld [vmem:[#allocation5 + $0xd80] ss:$16 sps:$4 sm:$0xff]   ;;  %v5261_v16 = vld [vmem:[#allocation5 + $0xd88] ss:$16 sps:$4 sm:$0xff]  }
 0x1ae   :  { %3487 = vmatprep.subr.bf16.mxu0 %v5176_v17  ;;  %3831 = vmatprep.subr.bf16.mxu1 %v5179_v20  ;;  %v5266_v17 = vld [vmem:[#allocation5 + $0xda4] ss:$16 sps:$4 sm:$0xff]   ;;  %v5269_v20 = vld [vmem:[#allocation5 + $0xdac] ss:$16 sps:$4 sm:$0xff]  }
 0x1b1   :  { %3488 = vmatpush1.bf16.msra.mxu0 %v5174_v22  ;;  %3832 = vmatpush1.bf16.msra.mxu1 %v5177_v24  ;;  %v5264_v22 = vld [vmem:[#allocation5 + $0xda0] ss:$16 sps:$4 sm:$0xff]   ;;  %v5267_v24 = vld [vmem:[#allocation5 + $0xda8] ss:$16 sps:$4 sm:$0xff]  }
 0x1b2   :  { %3489 = vmatprep.subr.bf16.mxu0 %v5182_v14  ;;  %3833 = vmatprep.subr.bf16.mxu1 %v5185_v15  ;;  %v5272_v14 = vld [vmem:[#allocation5 + $0xdc4] ss:$16 sps:$4 sm:$0xff]   ;;  %v5275_v15 = vld [vmem:[#allocation5 + $0xdcc] ss:$16 sps:$4 sm:$0xff]  }
 0x1b5   :  { %3490 = vmatpush1.bf16.msra.mxu0 %v5180_v27  ;;  %3834 = vmatpush1.bf16.msra.mxu1 %v5183_v28  ;;  %v5270_v27 = vld [vmem:[#allocation5 + $0xdc0] ss:$16 sps:$4 sm:$0xff]   ;;  %v5273_v28 = vld [vmem:[#allocation5 + $0xdc8] ss:$16 sps:$4 sm:$0xff]  }
 0x1b6   :  { %3502 = vmatprep.subr.bf16.mxu0 %v5188_v18  ;;  %3846 = vmatprep.subr.bf16.mxu1 %v5191_v19  ;;  %v5278_v18 = vld [vmem:[#allocation5 + $0xde4] ss:$16 sps:$4 sm:$0xff]   ;;  %v5281_v19 = vld [vmem:[#allocation5 + $0xdec] ss:$16 sps:$4 sm:$0xff]  }
 0x1b8   :  { %3492 = vmatmul.mubr.bf16.vlgmr.msra.gmra.mrb[0].mxu0 %v4012_v29  ;;  %3836 = vmatmul.mubr.bf16.vlgmr.msra.gmra.mrb[0].mxu1 %v4012_v29  ;;  %v5276_v29 = vld [vmem:[#allocation5 + $0xde0] ss:$16 sps:$4 sm:$0xff]  }
 0x1b9   :  { %3503 = vmatpush1.bf16.msra.mxu0 %v5186_v32  ;;  %3847 = vmatpush1.bf16.msra.mxu1 %v5189_v21  ;;  %v5279_v32 = vld [vmem:[#allocation5 + $0xde8] ss:$16 sps:$4 sm:$0xff]   ;;  %v5284_v21 = vld [vmem:[#allocation5 + $0xe04] ss:$16 sps:$4 sm:$0xff]  }
 0x1ba   :  { %3504 = vmatprep.subr.bf16.mxu0 %v5194_v23  ;;  %3848 = vmatprep.subr.bf16.mxu1 %v5197_v33  ;;  %v5287_v23 = vld [vmem:[#allocation5 + $0xe0c] ss:$16 sps:$4 sm:$0xff]   ;;  %v4014_v33 = vcombine.low %v5579_v30, %v5581_v31  ;;  %v5288_v30 = vld [vmem:[#allocation5 + $0xe20] ss:$16 sps:$4 sm:$0xff]   ;;  %v5291_v31 = vld [vmem:[#allocation5 + $0xe28] ss:$16 sps:$4 sm:$0xff]  }
 0x1bb   :  { %3534 = vmatprep.mubr.bf16.mxu0 %v4015_v34  ;;  %3878 = vmatprep.mubr.bf16.mxu1 %v4015_v34  ;;  %v5587_v34 = vld [vmem:[#allocation2 + $0x38] sm:$0xff] }
 0x1bd   :  { %3505 = vmatpush1.bf16.msra.mxu0 %v5192_v25  ;;  %3849 = vmatpush1.bf16.msra.mxu1 %v5195_v26  ;;  %v5589_v25 = vld [vmem:[#allocation2 + $0x78] sm:$0xff]  ;;  %v5282_v26 = vld [vmem:[#allocation5 + $0xe00] ss:$16 sps:$4 sm:$0xff]  }
 0x1be   :  { %3506 = vmatprep.subr.bf16.mxu0 %v5200_v35  ;;  %3850 = vmatprep.subr.bf16.mxu1 %v5203_v36  ;;  %v5285_v35 = vld [vmem:[#allocation5 + $0xe08] ss:$16 sps:$4 sm:$0xff]   ;;  %v5290_v36 = vld [vmem:[#allocation5 + $0xe24] ss:$16 sps:$4 sm:$0xff]  }
 0x1c1   :  { %3507 = vmatpush1.bf16.msra.mxu0 %v5198_v37  ;;  %3851 = vmatpush1.bf16.msra.mxu1 %v5201_v38  ;;  %v5293_v37 = vld [vmem:[#allocation5 + $0xe2c] ss:$16 sps:$4 sm:$0xff]   ;;  %v4017_v38 = vcombine.high %v5587_v34, %v5589_v25 }
 0x1c2   :  { %3508 = vmatprep.subr.bf16.mxu0 %v5206_v39  ;;  %3852 = vmatprep.subr.bf16.mxu1 %v5209_v40  ;;  %v5296_v39 = vld [vmem:[#allocation5 + $0xe44] ss:$16 sps:$4 sm:$0xff]   ;;  %v5299_v40 = vld [vmem:[#allocation5 + $0xe4c] ss:$16 sps:$4 sm:$0xff]  }
 0x1c5   :  { %3509 = vmatpush1.bf16.msra.mxu0 %v5204_v41  ;;  %3853 = vmatpush1.bf16.msra.mxu1 %v5207_v42  ;;  %v5294_v41 = vld [vmem:[#allocation5 + $0xe40] ss:$16 sps:$4 sm:$0xff]   ;;  %v5297_v42 = vld [vmem:[#allocation5 + $0xe48] ss:$16 sps:$4 sm:$0xff]  }
 0x1c6   :  { %3510 = vmatprep.subr.bf16.mxu0 %v5212_v43  ;;  %3854 = vmatprep.subr.bf16.mxu1 %v5215_v44  ;;  %v5302_v43 = vld [vmem:[#allocation5 + $0xe64] ss:$16 sps:$4 sm:$0xff]   ;;  %v5305_v44 = vld [vmem:[#allocation5 + $0xe6c] ss:$16 sps:$4 sm:$0xff]  }
 0x1c9   :  { %3511 = vmatpush1.bf16.msra.mxu0 %v5210_v45  ;;  %3855 = vmatpush1.bf16.msra.mxu1 %v5213_v46  ;;  %v5300_v45 = vld [vmem:[#allocation5 + $0xe60] ss:$16 sps:$4 sm:$0xff]   ;;  %v5303_v46 = vld [vmem:[#allocation5 + $0xe68] ss:$16 sps:$4 sm:$0xff]  }
 0x1ca   :  { %3512 = vmatprep.subr.bf16.mxu0 %v5218_v47  ;;  %3856 = vmatprep.subr.bf16.mxu1 %v5221_v48  ;;  %v5308_v47 = vld [vmem:[#allocation5 + $0xe84] ss:$16 sps:$4 sm:$0xff]   ;;  %v5311_v48 = vld [vmem:[#allocation5 + $0xe8c] ss:$16 sps:$4 sm:$0xff]  }
 0x1cd   :  { %3513 = vmatpush1.bf16.msra.mxu0 %v5216_v49  ;;  %3857 = vmatpush1.bf16.msra.mxu1 %v5219_v50  ;;  %v5306_v49 = vld [vmem:[#allocation5 + $0xe80] ss:$16 sps:$4 sm:$0xff]   ;;  %v5309_v50 = vld [vmem:[#allocation5 + $0xe88] ss:$16 sps:$4 sm:$0xff]  }
 0x1ce   :  { %3514 = vmatprep.subr.bf16.mxu0 %v5224_v51  ;;  %3858 = vmatprep.subr.bf16.mxu1 %v5227_v52  ;;  %v5314_v51 = vld [vmem:[#allocation5 + $0xea4] ss:$16 sps:$4 sm:$0xff]   ;;  %v5317_v52 = vld [vmem:[#allocation5 + $0xeac] ss:$16 sps:$4 sm:$0xff]  }
 0x1d1   :  { %3515 = vmatpush1.bf16.msra.mxu0 %v5222_v53  ;;  %3859 = vmatpush1.bf16.msra.mxu1 %v5225_v54  ;;  %v5312_v53 = vld [vmem:[#allocation5 + $0xea0] ss:$16 sps:$4 sm:$0xff]   ;;  %v5315_v54 = vld [vmem:[#allocation5 + $0xea8] ss:$16 sps:$4 sm:$0xff]  }
 0x1d2   :  { %3516 = vmatprep.subr.bf16.mxu0 %v5230_v55  ;;  %3860 = vmatprep.subr.bf16.mxu1 %v5233_v56  ;;  %v5320_v55 = vld [vmem:[#allocation5 + $0xec4] ss:$16 sps:$4 sm:$0xff]   ;;  %v5323_v56 = vld [vmem:[#allocation5 + $0xecc] ss:$16 sps:$4 sm:$0xff]  }
 0x1d5   :  { %3517 = vmatpush1.bf16.msra.mxu0 %v5228_v57  ;;  %3861 = vmatpush1.bf16.msra.mxu1 %v5231_v58  ;;  %v5318_v57 = vld [vmem:[#allocation5 + $0xec0] ss:$16 sps:$4 sm:$0xff]   ;;  %v5321_v58 = vld [vmem:[#allocation5 + $0xec8] ss:$16 sps:$4 sm:$0xff]  }
 0x1d6   :  { %3518 = vmatprep.subr.bf16.mxu0 %v5236_v59  ;;  %3862 = vmatprep.subr.bf16.mxu1 %v5239_v60  ;;  %v5326_v59 = vld [vmem:[#allocation5 + $0xee4] ss:$16 sps:$4 sm:$0xff]   ;;  %v5329_v60 = vld [vmem:[#allocation5 + $0xeec] ss:$16 sps:$4 sm:$0xff]  }
 0x1d9   :  { %3519 = vmatpush1.bf16.msra.mxu0 %v5234_v61  ;;  %3863 = vmatpush1.bf16.msra.mxu1 %v5237_v62  ;;  %v5324_v61 = vld [vmem:[#allocation5 + $0xee0] ss:$16 sps:$4 sm:$0xff]   ;;  %v5327_v62 = vld [vmem:[#allocation5 + $0xee8] ss:$16 sps:$4 sm:$0xff]  }
 0x1da   :  { %3520 = vmatprep.subr.bf16.mxu0 %v5242_v63  ;;  %3864 = vmatprep.subr.bf16.mxu1 %v5245_v0  ;;  %v5332_v63 = vld [vmem:[#allocation5 + $0xf04] ss:$16 sps:$4 sm:$0xff]   ;;  %v5335_v0 = vld [vmem:[#allocation5 + $0xf0c] ss:$16 sps:$4 sm:$0xff]  }
 0x1dd   :  { %3521 = vmatpush1.bf16.msra.mxu0 %v5240_v1  ;;  %3865 = vmatpush1.bf16.msra.mxu1 %v5243_v2  ;;  %v5330_v1 = vld [vmem:[#allocation5 + $0xf00] ss:$16 sps:$4 sm:$0xff]   ;;  %v5333_v2 = vld [vmem:[#allocation5 + $0xf08] ss:$16 sps:$4 sm:$0xff]  }
 0x1de   :  { %3522 = vmatprep.subr.bf16.mxu0 %v5248_v3  ;;  %3866 = vmatprep.subr.bf16.mxu1 %v5251_v4  ;;  %v5338_v3 = vld [vmem:[#allocation5 + $0xf24] ss:$16 sps:$4 sm:$0xff]   ;;  %v5341_v4 = vld [vmem:[#allocation5 + $0xf2c] ss:$16 sps:$4 sm:$0xff]  }
 0x1e1   :  { %3523 = vmatpush1.bf16.msra.mxu0 %v5246_v5  ;;  %3867 = vmatpush1.bf16.msra.mxu1 %v5249_v6  ;;  %v5336_v5 = vld [vmem:[#allocation5 + $0xf20] ss:$16 sps:$4 sm:$0xff]   ;;  %v5339_v6 = vld [vmem:[#allocation5 + $0xf28] ss:$16 sps:$4 sm:$0xff]  }
 0x1e2   :  { %3524 = vmatprep.subr.bf16.mxu0 %v5254_v7  ;;  %3868 = vmatprep.subr.bf16.mxu1 %v5257_v8  ;;  %v5344_v7 = vld [vmem:[#allocation5 + $0xf44] ss:$16 sps:$4 sm:$0xff]   ;;  %v5347_v8 = vld [vmem:[#allocation5 + $0xf4c] ss:$16 sps:$4 sm:$0xff]  }
 0x1e5   :  { %3525 = vmatpush1.bf16.msra.mxu0 %v5252_v9  ;;  %3869 = vmatpush1.bf16.msra.mxu1 %v5255_v10  ;;  %v5342_v9 = vld [vmem:[#allocation5 + $0xf40] ss:$16 sps:$4 sm:$0xff]   ;;  %v5345_v10 = vld [vmem:[#allocation5 + $0xf48] ss:$16 sps:$4 sm:$0xff]  }
 0x1e6   :  { %3526 = vmatprep.subr.bf16.mxu0 %v5260_v11  ;;  %3870 = vmatprep.subr.bf16.mxu1 %v5263_v12  ;;  %v5350_v11 = vld [vmem:[#allocation5 + $0xf64] ss:$16 sps:$4 sm:$0xff]   ;;  %v5353_v12 = vld [vmem:[#allocation5 + $0xf6c] ss:$16 sps:$4 sm:$0xff]  }
 0x1e9   :  { %3527 = vmatpush1.bf16.msra.mxu0 %v5258_v13  ;;  %3871 = vmatpush1.bf16.msra.mxu1 %v5261_v16  ;;  %v5348_v13 = vld [vmem:[#allocation5 + $0xf60] ss:$16 sps:$4 sm:$0xff]   ;;  %v5351_v16 = vld [vmem:[#allocation5 + $0xf68] ss:$16 sps:$4 sm:$0xff]  }
 0x1ea   :  { %3528 = vmatprep.subr.bf16.mxu0 %v5266_v17  ;;  %3872 = vmatprep.subr.bf16.mxu1 %v5269_v20  ;;  %v5356_v17 = vld [vmem:[#allocation5 + $0xf84] ss:$16 sps:$4 sm:$0xff]   ;;  %v5359_v20 = vld [vmem:[#allocation5 + $0xf8c] ss:$16 sps:$4 sm:$0xff]  }
 0x1ed   :  { %3529 = vmatpush1.bf16.msra.mxu0 %v5264_v22  ;;  %3873 = vmatpush1.bf16.msra.mxu1 %v5267_v24  ;;  %v5354_v22 = vld [vmem:[#allocation5 + $0xf80] ss:$16 sps:$4 sm:$0xff]   ;;  %v5357_v24 = vld [vmem:[#allocation5 + $0xf88] ss:$16 sps:$4 sm:$0xff]  }
 0x1ee   :  { %3530 = vmatprep.subr.bf16.mxu0 %v5272_v14  ;;  %3874 = vmatprep.subr.bf16.mxu1 %v5275_v15  ;;  %v5362_v14 = vld [vmem:[#allocation5 + $0xfa4] ss:$16 sps:$4 sm:$0xff]   ;;  %v5365_v15 = vld [vmem:[#allocation5 + $0xfac] ss:$16 sps:$4 sm:$0xff]  }
 0x1f1   :  { %3531 = vmatpush1.bf16.msra.mxu0 %v5270_v27  ;;  %3875 = vmatpush1.bf16.msra.mxu1 %v5273_v28  ;;  %v5360_v27 = vld [vmem:[#allocation5 + $0xfa0] ss:$16 sps:$4 sm:$0xff]   ;;  %v5363_v28 = vld [vmem:[#allocation5 + $0xfa8] ss:$16 sps:$4 sm:$0xff]  }
 0x1f2   :  { %3532 = vmatprep.subr.bf16.mxu0 %v5278_v18  ;;  %3876 = vmatprep.subr.bf16.mxu1 %v5281_v19  ;;  %v5368_v18 = vld [vmem:[#allocation5 + $0xfc4] ss:$16 sps:$4 sm:$0xff]   ;;  %v5371_v19 = vld [vmem:[#allocation5 + $0xfcc] ss:$16 sps:$4 sm:$0xff]  }
 0x1f5   :  { %3533 = vmatpush1.bf16.msra.mxu0 %v5276_v29  ;;  %3877 = vmatpush1.bf16.msra.mxu1 %v5279_v32  ;;  %v5366_v29 = vld [vmem:[#allocation5 + $0xfc0] ss:$16 sps:$4 sm:$0xff]   ;;  %v5369_v32 = vld [vmem:[#allocation5 + $0xfc8] ss:$16 sps:$4 sm:$0xff]  }
 0x1f6   :  { %3545 = vmatprep.subr.bf16.mxu0 %v5284_v21  ;;  %3889 = vmatprep.subr.bf16.mxu1 %v5287_v23  ;;  %v5374_v21 = vld [vmem:[#allocation5 + $0xfe4] ss:$16 sps:$4 sm:$0xff]   ;;  %v5377_v23 = vld [vmem:[#allocation5 + $0xfec] ss:$16 sps:$4 sm:$0xff]  }
 0x1f8   :  { %3535 = vmatmul.mubr.bf16.vlgmr.msra.gmra.mrb[0].mxu0 %v4014_v33  ;;  %3879 = vmatmul.mubr.bf16.vlgmr.msra.gmra.mrb[0].mxu1 %v4014_v33  ;;  %v5372_v33 = vld [vmem:[#allocation5 + $0xfe0] ss:$16 sps:$4 sm:$0xff]  }
 0x1f9   :  { %3546 = vmatpush1.bf16.msra.mxu0 %v5282_v26  ;;  %3890 = vmatpush1.bf16.msra.mxu1 %v5285_v35  ;;  %v5375_v26 = vld [vmem:[#allocation5 + $0xfe8] ss:$16 sps:$4 sm:$0xff]   ;;  %v4016_v35 = vcombine.low %v5587_v34, %v5589_v25 }
 0x1fa   :  { %3547 = vmatprep.subr.bf16.mxu0 %v5290_v36  ;;  %3891 = vmatprep.subr.bf16.mxu1 %v5293_v37  ;;  %v584_v36 = vlaneseq }
 0x1fb   :  { %3577 = vmatprep.mubr.bf16.mxu0 %v4017_v38  ;;  %3921 = vmatprep.mubr.bf16.mxu1 %v4017_v38 }
 0x1fc   :  { %v585_v37 = vshrl.u32 %v584_v36, 7 }
 0x1fd   :  { %3548 = vmatpush1.bf16.msra.mxu0 %v5288_v30  ;;  %3892 = vmatpush1.bf16.msra.mxu1 %v5291_v31  ;;  %v582_v31 = vld [vmem:[#allocation7] sm:$0xf] }
 0x1fe   :  { %3549 = vmatprep.subr.bf16.mxu0 %v5296_v39  ;;  %3893 = vmatprep.subr.bf16.mxu1 %v5299_v40  ;;  %v586_v38 = vsub.s32 0, %v585_v37  ;;  %v594_v30 = vsub.s32 2, %v585_v37  ;;  %v590_v39 = vsub.s32 1, %v585_v37  ;;  %v598_v40 = vsub.s32 3, %v585_v37 }
 0x201   :  { %3550 = vmatpush1.bf16.msra.mxu0 %v5294_v41  ;;  %3894 = vmatpush1.bf16.msra.mxu1 %v5297_v42  ;;  %v587_v41 = vrot.slane %v582_v31, %v586_v38  ;;  %v595_v42 = vrot.slane %v582_v31, %v594_v30 }
 0x202   :  { %3551 = vmatprep.subr.bf16.mxu0 %v5302_v43  ;;  %3895 = vmatprep.subr.bf16.mxu1 %v5305_v44  ;;  %v591_v43 = vrot.slane %v582_v31, %v590_v39  ;;  %v599_v44 = vrot.slane %v582_v31, %v598_v40 }
 0x205   :  { %3552 = vmatpush1.bf16.msra.mxu0 %v5300_v45  ;;  %3896 = vmatpush1.bf16.msra.mxu1 %v5303_v46 }
 0x206   :  { %3553 = vmatprep.subr.bf16.mxu0 %v5308_v47  ;;  %3897 = vmatprep.subr.bf16.mxu1 %v5311_v48 }
 0x209   :  { %3554 = vmatpush1.bf16.msra.mxu0 %v5306_v49  ;;  %3898 = vmatpush1.bf16.msra.mxu1 %v5309_v50 }
 0x20a   :  { %3555 = vmatprep.subr.bf16.mxu0 %v5314_v51  ;;  %3899 = vmatprep.subr.bf16.mxu1 %v5317_v52 }
 0x20d   :  { %3556 = vmatpush1.bf16.msra.mxu0 %v5312_v53  ;;  %3900 = vmatpush1.bf16.msra.mxu1 %v5315_v54 }
 0x20e   :  { %3557 = vmatprep.subr.bf16.mxu0 %v5320_v55  ;;  %3901 = vmatprep.subr.bf16.mxu1 %v5323_v56 }
 0x211   :  { %3558 = vmatpush1.bf16.msra.mxu0 %v5318_v57  ;;  %3902 = vmatpush1.bf16.msra.mxu1 %v5321_v58 }
 0x212   :  { %3559 = vmatprep.subr.bf16.mxu0 %v5326_v59  ;;  %3903 = vmatprep.subr.bf16.mxu1 %v5329_v60 }
 0x215   :  { %3560 = vmatpush1.bf16.msra.mxu0 %v5324_v61  ;;  %3904 = vmatpush1.bf16.msra.mxu1 %v5327_v62 }
 0x216   :  { %3561 = vmatprep.subr.bf16.mxu0 %v5332_v63  ;;  %3905 = vmatprep.subr.bf16.mxu1 %v5335_v0 }
 0x219   :  { %3562 = vmatpush1.bf16.msra.mxu0 %v5330_v1  ;;  %3906 = vmatpush1.bf16.msra.mxu1 %v5333_v2 }
 0x21a   :  { %3563 = vmatprep.subr.bf16.mxu0 %v5338_v3  ;;  %3907 = vmatprep.subr.bf16.mxu1 %v5341_v4 }
 0x21d   :  { %3564 = vmatpush1.bf16.msra.mxu0 %v5336_v5  ;;  %3908 = vmatpush1.bf16.msra.mxu1 %v5339_v6 }
 0x21e   :  { %3565 = vmatprep.subr.bf16.mxu0 %v5344_v7  ;;  %3909 = vmatprep.subr.bf16.mxu1 %v5347_v8 }
 0x221   :  { %3566 = vmatpush1.bf16.msra.mxu0 %v5342_v9  ;;  %3910 = vmatpush1.bf16.msra.mxu1 %v5345_v10 }
 0x222   :  { %3567 = vmatprep.subr.bf16.mxu0 %v5350_v11  ;;  %3911 = vmatprep.subr.bf16.mxu1 %v5353_v12 }
 0x225   :  { %3568 = vmatpush1.bf16.msra.mxu0 %v5348_v13  ;;  %3912 = vmatpush1.bf16.msra.mxu1 %v5351_v16 }
 0x226   :  { %3569 = vmatprep.subr.bf16.mxu0 %v5356_v17  ;;  %3913 = vmatprep.subr.bf16.mxu1 %v5359_v20 }
 0x229   :  { %3570 = vmatpush1.bf16.msra.mxu0 %v5354_v22  ;;  %3914 = vmatpush1.bf16.msra.mxu1 %v5357_v24 }
 0x22a   :  { %3571 = vmatprep.subr.bf16.mxu0 %v5362_v14  ;;  %3915 = vmatprep.subr.bf16.mxu1 %v5365_v15 }
 0x22d   :  { %3572 = vmatpush1.bf16.msra.mxu0 %v5360_v27  ;;  %3916 = vmatpush1.bf16.msra.mxu1 %v5363_v28 }
 0x22e   :  { %3573 = vmatprep.subr.bf16.mxu0 %v5368_v18  ;;  %3917 = vmatprep.subr.bf16.mxu1 %v5371_v19 }
 0x231   :  { %3574 = vmatpush1.bf16.msra.mxu0 %v5366_v29  ;;  %3918 = vmatpush1.bf16.msra.mxu1 %v5369_v32 }
 0x232   :  { %3575 = vmatprep.subr.bf16.mxu0 %v5374_v21  ;;  %3919 = vmatprep.subr.bf16.mxu1 %v5377_v23 }
 0x235   :  { %3576 = vmatpush1.bf16.msra.mxu0 %v5372_v33  ;;  %3920 = vmatpush1.bf16.msra.mxu1 %v5375_v26 }
 0x238   :  { %3578 = vmatmul.mubr.bf16.vlgmr.msra.gmra.mrb[0].mxu0 %v4016_v35  ;;  %3922 = vmatmul.mubr.bf16.vlgmr.msra.gmra.mrb[0].mxu1 %v4016_v35 }
 0x30b   :  { %v3579_v45 = vpop.f32.mrb[0].mxu0  ;;  %v3923_v46 = vpop.f32.mrb[0].mxu1 }
 0x30c   :  { %v4538_v47 = vadd.f32 %v3579_v45, %v587_v41  ;;  %v4542_v48 = vadd.f32 %v3923_v46, %v595_v42  ;;  %v3581_v34 = vpop.f32.mrb[1].mxu0  ;;  %v3925_v25 = vpop.f32.mrb[1].mxu1 }
 0x30d   :  { %v4539_v49 = vadd.f32 %v3581_v34, %v591_v43  ;;  %v4543_v50 = vadd.f32 %v3925_v25, %v599_v44  ;;  %v3583_v51 = vpop.f32.mrb[2].mxu0  ;;  %v3927_v52 = vpop.f32.mrb[2].mxu1 }
 0x30e   :  { %vm3932_vm0 = vcmp.ge.f32.partialorder %v4538_v47, 0.0  ;;  %v3940_v53 = vmul.f32 0.2, %v4538_v47  ;;  %vm3934_vm1 = vcmp.ge.f32.partialorder %v4542_v48, 0.0  ;;  %v3942_v54 = vmul.f32 0.2, %v4542_v48 }
 0x30f   :  { %vm3933_vm2 = vcmp.ge.f32.partialorder %v4539_v49, 0.0  ;;  %v3941_v55 = vmul.f32 0.2, %v4539_v49  ;;  %vm3935_vm3 = vcmp.ge.f32.partialorder %v4543_v50, 0.0  ;;  %v3943_v56 = vmul.f32 0.2, %v4543_v50 }
 0x310   :  { %v3948_v57 = vsel %vm3932_vm0, %v4538_v47, %v3940_v53  ;;  %v3950_v58 = vsel %vm3934_vm1, %v4542_v48, %v3942_v54  ;;  %v4540_v59 = vadd.f32 %v3583_v51, %v587_v41  ;;  %v4544_v60 = vadd.f32 %v3927_v52, %v595_v42  ;;  %v3585_v61 = vpop.f32.mrb[3].mxu0  ;;  %v3929_v62 = vpop.f32.mrb[3].mxu1 }
 0x311   :  { %v3949_v63 = vsel %vm3933_vm2, %v4539_v49, %v3941_v55  ;;  %v3951_v0 = vsel %vm3935_vm3, %v4543_v50, %v3943_v56  ;;  %v4541_v1 = vadd.f32 %v3585_v61, %v591_v43  ;;  %v4545_v2 = vadd.f32 %v3929_v62, %v599_v44 }
 0x312   :  { %v4534_v3 = vpack.c.bf16 %v3949_v63, %v3948_v57  ;;  %v4535_v4 = vpack.c.bf16 %v3951_v0, %v3950_v58  ;;  %vm3936_vm4 = vcmp.ge.f32.partialorder %v4540_v59, 0.0  ;;  %v3944_v5 = vmul.f32 0.2, %v4540_v59 }
 0x313   :  { %vm3938_vm5 = vcmp.ge.f32.partialorder %v4544_v60, 0.0  ;;  %v3946_v6 = vmul.f32 0.2, %v4544_v60  ;;  %vm3937_vm6 = vcmp.ge.f32.partialorder %v4541_v1, 0.0  ;;  %v3945_v7 = vmul.f32 0.2, %v4541_v1 }
 0x314   :  { %3980 = vst [vmem:[#allocation8] sm:$0xff] %v4534_v3  ;;  %3981 = vst [vmem:[#allocation8 + $0x8] sm:$0xff] %v4535_v4  ;;  %v3952_v8 = vsel %vm3936_vm4, %v4540_v59, %v3944_v5  ;;  %vm3939_vm7 = vcmp.ge.f32.partialorder %v4545_v2, 0.0  ;;  %v3947_v9 = vmul.f32 0.2, %v4545_v2 }
 0x315   :  { %v3954_v10 = vsel %vm3938_vm5, %v4544_v60, %v3946_v6  ;;  %v3953_v11 = vsel %vm3937_vm6, %v4541_v1, %v3945_v7 }
 0x316   :  { %v4536_v12 = vpack.c.bf16 %v3953_v11, %v3952_v8  ;;  %v3955_v13 = vsel %vm3939_vm7, %v4545_v2, %v3947_v9 }
 0x317   :  { %v4537_v16 = vpack.c.bf16 %v3955_v13, %v3954_v10 }
 0x318   :  { %3982 = vst [vmem:[#allocation8 + $0x10] sm:$0xff] %v4536_v12 }
 0x319   :  { %3983 = vst [vmem:[#allocation8 + $0x18] sm:$0xff] %v4537_v16 }
 0x31a   :  { %5455 = shalt.err (!%p5452_p0)
}
 0x31b   :  { %s5456_s29 = scalar_lea.hbm %s5613_s3, 512 }
 0x31c   :  { %p5457_p1 = scmp.ne.s32.totalorder %s5613_s3, %s5456_s29  ;;  %p5460_p2 = scmp.lt.u32.totalorder %s5456_s29, %s5613_s3 }
 0x31e   :  { %p5462_p3 = pnand %p5460_p2, %p5457_p1 }
 0x320   :  { %5465 = shalt.err (!%p5462_p3)
}
 0x321   :  { %3995 = dma.vmem_to_hbm [thread:$0]  %s3990_s25, 512, %s5613_s3, [#allocation4], %s5473_s22, %s5473_s22, %s5474_s23  }
 0x322   :  { %5470 = dma.done.wait [#allocation4], 512  }
 0x323   :  { %5471 = vsyncadd [#allocation4], 4294966784 }
 0x324   :  { %3999 = vsyncpa [#allocation3], 1 }
 0x325   :  { %4000 = vsyncpa [#allocation6], 1 }
 0x326   :  { %4001 = vsyncpa [#allocation4], 1 }

</bundles_post_ra>
